<compile_context>
chip_gen: v7x
topology: tpu7x:2x2x1
jax: 0.10.0
libtpu: 0.0.40
codegen_flags: <defaults>
</compile_context>

<pallas_src>
import math
import functools

import jax
import jax.numpy as jnp
import numpy as np
from jax.experimental import pallas as pl
from jax.experimental.pallas import tpu as pltpu


def _self_att_enc_kernel(
    x_ref,                      # (A_BLK, T, D)        activation tile (native dtype)
    bias_ref,                   # (A_BLK*H, 1, T) f32  additive key-padding bias (0 / -1e30)
    wqkv_ref, bqkv_ref,         # (D, 3D) matmul dtype, (1, 3D) f32   [LN-X affine + q-scale folded in]
    wo_ref, bo_ref,             # (D, D) matmul dtype,  (1, D) f32
    w1_ref, b1_ref,             # (D, D) matmul dtype,  (1, D) f32
    gz_ref, bz_ref,             # (1, D) f32            LayerNorm Z affine
    o_ref,                      # (A_BLK, T, D)
    *, head_num, eps=1e-5,
):
    x3 = x_ref[...].astype(jnp.float32)          # (A_BLK, T, D)
    ab, t, d = x3.shape
    x2 = x3.reshape(ab * t, d)                   # merge leading dims (no relayout)
    mdt = wqkv_ref.dtype                         # matmul operand dtype (bf16 by default)
    dh = d // head_num

    # ---- LayerNorm over the feature dim (layer_X_); affine folded into wqkv ----
    mu = jnp.mean(x2, axis=-1, keepdims=True)
    var = jnp.mean(jnp.square(x2 - mu), axis=-1, keepdims=True)
    xn = (x2 - mu) * jax.lax.rsqrt(var + eps)

    # ---- fused QKV projection: one MXU matmul with a 3D-lane output ----
    qkv = jnp.dot(xn.astype(mdt), wqkv_ref[...],
                  preferred_element_type=jnp.float32) + bqkv_ref[...]
    q = qkv[:, :d].reshape(ab, t, d)             # q already scaled by 1/sqrt(dh) at pack time
    k = qkv[:, d:2 * d].reshape(ab, t, d)
    v = qkv[:, 2 * d:].reshape(ab, t, d)

    # ---- batch heads into the einsum batch dim: (ab, T, H*dh) -> (ab*H, T, dh) ----
    # Only lane slices + a leading-dim stack (cheap), no lane-splitting reshape.
    def split_heads(a):
        parts = [a[:, :, h * dh:(h + 1) * dh] for h in range(head_num)]
        return jnp.stack(parts, axis=1).reshape(ab * head_num, t, dh)

    qb = split_heads(q).astype(mdt)
    kb = split_heads(k).astype(mdt)
    vb = split_heads(v).astype(mdt)
    bias = bias_ref[...]                         # (ab*H, 1, t), agent-major head order

    # ---- single batched attention (all heads at once), scores/softmax in f32 ----
    s = jnp.einsum('bqd,bkd->bqk', qb, kb,
                   preferred_element_type=jnp.float32) + bias        # (ab*H, T, T)
    m = jnp.maximum(jnp.max(s, axis=-1, keepdims=True), 0.0)         # include zero-attn logit 0
    p = jnp.exp(s - m)
    denom = jnp.sum(p, axis=-1, keepdims=True) + jnp.exp(-m)         # + zero-attn term
    inv = pl.reciprocal(denom, approx=True)                          # EUP slot, ~free
    ob = jnp.einsum('bqk,bkd->bqd', p.astype(mdt), vb,
                    preferred_element_type=jnp.float32) * inv        # (ab*H, T, dh)

    o4 = ob.reshape(ab, head_num, t, dh)
    att = jnp.concatenate([o4[:, h] for h in range(head_num)], axis=-1).reshape(ab * t, d)

    # ---- out-proj, residual, FFN (Linear+ReLU), LayerNorm Z ----
    att = jnp.dot(att.astype(mdt), wo_ref[...],
                  preferred_element_type=jnp.float32) + bo_ref[...]
    s_res = att + x2
    f1 = jnp.maximum(
        jnp.dot(s_res.astype(mdt), w1_ref[...],
                preferred_element_type=jnp.float32) + b1_ref[...], 0.0)
    mu2 = jnp.mean(f1, axis=-1, keepdims=True)
    var2 = jnp.mean(jnp.square(f1 - mu2), axis=-1, keepdims=True)
    z = (f1 - mu2) * jax.lax.rsqrt(var2 + eps) * gz_ref[...] + bz_ref[...]
    o_ref[...] = z.reshape(ab, t, d).astype(o_ref.dtype)


def pack_params(params, head_num, matmul_dtype=jnp.bfloat16):
    """One-time packing of PyTorch-layout weights into kernel layout.

    Hoists all per-call work off the hot path:
      * transposes PyTorch (out, in) weights so the kernel computes x @ W;
      * fuses Wq/Wk/Wv into a single (D, 3D) matrix;
      * folds the LayerNorm-X affine (gamma, beta) and the 1/sqrt(dh) query
        scale into wqkv / bqkv;
      * pre-casts all matmul weights to `matmul_dtype` (bf16 default: MXU-native
        on v5e/v6e/v7x, halves weight DMA/VMEM); biases/LN-Z stay f32.
    """
    f32 = lambda a: jnp.asarray(a, jnp.float32)
    row = lambda b: f32(b).reshape(1, -1)
    gx, bx = f32(params["gx"]), f32(params["bx"])
    d = gx.shape[0]
    scale = 1.0 / math.sqrt(d // head_num)

    def fold_w(w, s=1.0):                  # diag(gx) @ W^T, optional q-scale
        return (gx[:, None] * f32(w).T) * s

    def fold_b(w, b, s=1.0):               # (bx @ W^T + b), optional q-scale
        return ((bx @ f32(w).T + f32(b)) * s).reshape(1, -1)

    wqkv = jnp.concatenate([fold_w(params["wq"], scale),
                            fold_w(params["wk"]),
                            fold_w(params["wv"])], axis=1).astype(matmul_dtype)
    bqkv = jnp.concatenate([fold_b(params["wq"], params["bq"], scale),
                            fold_b(params["wk"], params["bk"]),
                            fold_b(params["wv"], params["bv"])], axis=1)   # f32
    return {
        "wqkv": wqkv, "bqkv": bqkv,
        "wo": f32(params["wo"]).T.astype(matmul_dtype), "bo": row(params["bo"]),
        "w1": f32(params["w1"]).T.astype(matmul_dtype), "b1": row(params["b1"]),
        "gz": row(params["gz"]), "bz": row(params["bz"]),
    }


def _pick_a_blk(A, T, max_rows=1024):
    """Largest divisor of A with a_blk*T <= max_rows, preferring an EVEN number
    of grid blocks so the 'parallel' grid axis load-balances across v7x's two
    TensorCores. On single-TC chips (v5e/v6e) callers may pass a larger
    max_rows (or a_blk=A) to minimize grid steps."""
    divisors = [a for a in range(1, A + 1) if A % a == 0 and a * T <= max_rows]
    if not divisors:
        return 1
    even = [a for a in divisors if (A // a) % 2 == 0]
    pool = even if even else divisors
    return max(pool)


def self_att_layer_enc(x, batch_mask, padding_mask, packed, *, head_num,
                       a_blk=None, out_dtype=None,
                       vmem_limit_bytes=48 * 1024 * 1024):
    """Forward pass of SelfAttLayer_Enc (across_time=True). Returns Z_ (A, T, D).

    `packed` must come from pack_params() (computed once, off the hot path);
    its weight dtype (bf16 by default) sets the MXU operand dtype. x is passed
    in its native dtype (no up-cast); output dtype defaults to x.dtype.
    """
    A, T, D = x.shape
    assert batch_mask.shape == (A, A)
    assert padding_mask.shape == (A, T)
    # batch_mask is only used (as attn_mask over agents) in the across_time=False
    # branch of the PyTorch module; this kernel implements across_time=True,
    # where the module ignores it beyond the shape check.
    # TODO(synk): across_time=False branch (attention over agents with
    # attn_mask=batch_mask) is not implemented here.
    assert D % head_num == 0
    # Perf note: D % 128 == 0 (production D=256) keeps the output tile lane-dense;
    # the demo D=32 is lane-sparse (masked stores) but functionally correct.

    if a_blk is None:
        a_blk = _pick_a_blk(A, T)
    assert A % a_blk == 0, f"A={A} must be divisible by a_blk={a_blk}"
    out_dtype = out_dtype or x.dtype

    # Additive key-padding bias, pre-broadcast over heads (agent-major head order)
    # so the kernel does a single add per block instead of H compare+selects.
    bias = jnp.where(padding_mask, jnp.float32(-1e30), jnp.float32(0.0))      # (A, T)
    bias = jnp.broadcast_to(bias[:, None, None, :],
                            (A, head_num, 1, T)).reshape(A * head_num, 1, T)

    d3 = packed["wqkv"].shape[1]
    full = lambda shape: pl.BlockSpec(shape, lambda a: (0, 0))   # resident weights
    in_specs = [
        pl.BlockSpec((a_blk, T, D), lambda a: (a, 0, 0)),             # x
        pl.BlockSpec((a_blk * head_num, 1, T), lambda a: (a, 0, 0)),  # mask bias
        full((D, d3)), full((1, d3)),                                 # wqkv, bqkv
        full((D, D)), full((1, D)),                                   # wo, bo
        full((D, D)), full((1, D)),                                   # w1, b1
        full((1, D)), full((1, D)),                                   # gz, bz
    ]

    return pl.pallas_call(
        functools.partial(_self_att_enc_kernel, head_num=head_num),
        out_shape=jax.ShapeDtypeStruct((A, T, D), out_dtype),
        grid=(A // a_blk,),
        in_specs=in_specs,
        out_specs=pl.BlockSpec((a_blk, T, D), lambda a: (a, 0, 0)),
        compiler_params=pltpu.CompilerParams(
            dimension_semantics=("parallel",),       # megacore / v7x 2-TC sharding
            vmem_limit_bytes=vmem_limit_bytes,       # 48 MiB: safe on v7x (64 MiB physical)
        ),
    )(x, bias,
      packed["wqkv"], packed["bqkv"], packed["wo"], packed["bo"],
      packed["w1"], packed["b1"], packed["gz"], packed["bz"])


# ---------------- pure-JAX reference (mirrors torch semantics) ----------------
def _reference(x, padding_mask, p, head_num, eps=1e-5):
    A, T, D = x.shape
    dh = D // head_num

    def ln(v, g, b):
        mu = v.mean(-1, keepdims=True)
        var = jnp.square(v - mu).mean(-1, keepdims=True)
        return (v - mu) / jnp.sqrt(var + eps) * g + b

    xn = ln(x, p["gx"], p["bx"])
    q = xn @ p["wq"].T + p["bq"]
    k = xn @ p["wk"].T + p["bk"]
    v = xn @ p["wv"].T + p["bv"]

    def split(t):
        return t.reshape(A, T, head_num, dh).transpose(0, 2, 1, 3)   # (A, H, T, dh)

    qh = split(q) / math.sqrt(dh)
    kh = split(k)
    vh = split(v)
    # add_zero_attn: append a zero key/value, never masked
    kh = jnp.concatenate([kh, jnp.zeros((A, head_num, 1, dh))], axis=2)
    vh = jnp.concatenate([vh, jnp.zeros((A, head_num, 1, dh))], axis=2)
    kpm = jnp.concatenate([padding_mask, jnp.zeros((A, 1), bool)], axis=1)  # (A, T+1)

    scores = jnp.einsum("ahqd,ahkd->ahqk", qh, kh)
    scores = jnp.where(kpm[:, None, None, :], -1e30, scores)
    attn = jax.nn.softmax(scores, axis=-1)
    out = jnp.einsum("ahqk,ahkd->ahqd", attn, vh)
    out = out.transpose(0, 2, 1, 3).reshape(A, T, D)
    out = out @ p["wo"].T + p["bo"]
    s = out + x
    f1 = jnp.maximum(s @ p["w1"].T + p["b1"], 0.0)
    return ln(f1, p["gz"], p["bz"])


if __name__ == "__main__":
    A, T, D, H = 4, 8, 32, 4   # agents, time_steps, feature_dim, head_num

    key = jax.random.PRNGKey(0)
    ks = jax.random.split(key, 16)

    params = {
        "gx": 1.0 + 0.1 * jax.random.normal(ks[0], (D,), jnp.float32),
        "bx": 0.1 * jax.random.normal(ks[1], (D,), jnp.float32),
        "wq": 0.1 * jax.random.normal(ks[2], (D, D), jnp.float32),
        "wk": 0.1 * jax.random.normal(ks[3], (D, D), jnp.float32),
        "wv": 0.1 * jax.random.normal(ks[4], (D, D), jnp.float32),
        "bq": 0.1 * jax.random.normal(ks[5], (D,), jnp.float32),
        "bk": 0.1 * jax.random.normal(ks[6], (D,), jnp.float32),
        "bv": 0.1 * jax.random.normal(ks[7], (D,), jnp.float32),
        "wo": 0.1 * jax.random.normal(ks[8], (D, D), jnp.float32),
        "bo": 0.1 * jax.random.normal(ks[9], (D,), jnp.float32),
        "w1": 0.1 * jax.random.normal(ks[10], (D, D), jnp.float32),
        "b1": 0.1 * jax.random.normal(ks[11], (D,), jnp.float32),
        "gz": 1.0 + 0.1 * jax.random.normal(ks[12], (D,), jnp.float32),
        "bz": 0.1 * jax.random.normal(ks[13], (D,), jnp.float32),
    }

    x = jax.random.normal(ks[14], (A, T, D), jnp.float32)
    batch_mask = jnp.zeros((A, A), jnp.float32)        # unused (across_time=True)
    padding_mask = (jnp.zeros((A, T), bool)
                    .at[0, T - 2:].set(True)
                    .at[1, T - 1:].set(True)
                    .at[3, T - 3:].set(True))

    ref = _reference(x, padding_mask, params, H)
    fwd = jax.jit(functools.partial(self_att_layer_enc, head_num=H))

    # f32-operand path: tight numerical check against the pure-JAX reference
    # (tolerance accounts for the approx EUP reciprocal and the pack-time folds).
    packed_f32 = pack_params(params, H, matmul_dtype=jnp.float32)
    out_f32 = jax.block_until_ready(fwd(x, batch_mask, padding_mask, packed_f32))
    np.testing.assert_allclose(np.asarray(out_f32), np.asarray(ref), rtol=5e-3, atol=5e-3)

    # default bf16-operand path (MXU-native on v5e/v6e/v7x, f32 accumulation)
    packed_bf16 = pack_params(params, H)               # matmul_dtype defaults to bfloat16
    out_bf16 = jax.block_until_ready(fwd(x, batch_mask, padding_mask, packed_bf16))
    assert np.isfinite(np.asarray(out_bf16)).all()
    np.testing.assert_allclose(np.asarray(out_bf16), np.asarray(ref), rtol=1e-1, atol=1e-1)

    print("KERNEL_OK")
</pallas_src>

<mosaic_0001>
module attributes {stable_mosaic.version = 11 : i64} {
  func.func @_self_att_enc_kernel(%arg0: i32, %arg1: memref<2x8x32xf32, #tpu.memory_space<vmem>>, %arg2: memref<8x1x8xf32, #tpu.memory_space<vmem>>, %arg3: memref<32x96xf32, #tpu.memory_space<vmem>>, %arg4: memref<1x96xf32, #tpu.memory_space<vmem>>, %arg5: memref<32x32xf32, #tpu.memory_space<vmem>>, %arg6: memref<1x32xf32, #tpu.memory_space<vmem>>, %arg7: memref<32x32xf32, #tpu.memory_space<vmem>>, %arg8: memref<1x32xf32, #tpu.memory_space<vmem>>, %arg9: memref<1x32xf32, #tpu.memory_space<vmem>>, %arg10: memref<1x32xf32, #tpu.memory_space<vmem>>, %arg11: memref<2x8x32xf32, #tpu.memory_space<vmem>>) attributes {dimension_semantics = [#tpu.dimension_semantics<parallel>], iteration_bounds = array<i64: 2>, scalar_prefetch = 0 : i64, scratch_operands = 0 : i64, tpu.core_type = #tpu.core_type<tc>, window_params = [{transform_indices = @transform_0, window_bounds = array<i64: 2, 8, 32>}, {transform_indices = @transform_1, window_bounds = array<i64: 8, 1, 8>}, {pipeline_mode = #tpu.pipeline_mode<synchronous>, transform_indices = @transform_2, window_bounds = array<i64: 32, 96>}, {pipeline_mode = #tpu.pipeline_mode<synchronous>, transform_indices = @transform_3, window_bounds = array<i64: 1, 96>}, {pipeline_mode = #tpu.pipeline_mode<synchronous>, transform_indices = @transform_4, window_bounds = array<i64: 32, 32>}, {pipeline_mode = #tpu.pipeline_mode<synchronous>, transform_indices = @transform_5, window_bounds = array<i64: 1, 32>}, {pipeline_mode = #tpu.pipeline_mode<synchronous>, transform_indices = @transform_6, window_bounds = array<i64: 32, 32>}, {pipeline_mode = #tpu.pipeline_mode<synchronous>, transform_indices = @transform_7, window_bounds = array<i64: 1, 32>}, {pipeline_mode = #tpu.pipeline_mode<synchronous>, transform_indices = @transform_8, window_bounds = array<i64: 1, 32>}, {pipeline_mode = #tpu.pipeline_mode<synchronous>, transform_indices = @transform_9, window_bounds = array<i64: 1, 32>}, {transform_indices = @transform_10, window_bounds = array<i64: 2, 8, 32>}]} {
    %c0 = arith.constant 0 : index
    %c0_0 = arith.constant 0 : index
    %c0_1 = arith.constant 0 : index
    %0 = vector.load %arg1[%c0, %c0_0, %c0_1] : memref<2x8x32xf32, #tpu.memory_space<vmem>>, vector<2x8x32xf32>
    %1 = vector.shape_cast %0 : vector<2x8x32xf32> to vector<16x32xf32>
    %cst = arith.constant dense<0.000000e+00> : vector<16xf32>
    %2 = vector.multi_reduction <add>, %1, %cst [1] : vector<16x32xf32> to vector<16xf32>
    %3 = vector.shape_cast %2 : vector<16xf32> to vector<16x1xf32>
    %cst_2 = arith.constant 3.200000e+01 : f32
    %4 = vector.broadcast %cst_2 : f32 to vector<16x1xf32>
    %5 = arith.divf %3, %4 : vector<16x1xf32>
    %6 = vector.broadcast %5 : vector<16x1xf32> to vector<16x32xf32>
    %7 = arith.subf %1, %6 : vector<16x32xf32>
    %8 = arith.mulf %7, %7 : vector<16x32xf32>
    %cst_3 = arith.constant dense<0.000000e+00> : vector<16xf32>
    %9 = vector.multi_reduction <add>, %8, %cst_3 [1] : vector<16x32xf32> to vector<16xf32>
    %10 = vector.shape_cast %9 : vector<16xf32> to vector<16x1xf32>
    %cst_4 = arith.constant 3.200000e+01 : f32
    %11 = vector.broadcast %cst_4 : f32 to vector<16x1xf32>
    %12 = arith.divf %10, %11 : vector<16x1xf32>
    %13 = vector.broadcast %5 : vector<16x1xf32> to vector<16x32xf32>
    %14 = arith.subf %1, %13 : vector<16x32xf32>
    %cst_5 = arith.constant 9.99999974E-6 : f32
    %15 = vector.broadcast %cst_5 : f32 to vector<16x1xf32>
    %16 = arith.addf %12, %15 : vector<16x1xf32>
    %17 = math.rsqrt %16 : vector<16x1xf32>
    %18 = vector.broadcast %17 : vector<16x1xf32> to vector<16x32xf32>
    %19 = arith.mulf %14, %18 : vector<16x32xf32>
    %c0_6 = arith.constant 0 : index
    %c0_7 = arith.constant 0 : index
    %20 = vector.load %arg3[%c0_6, %c0_7] : memref<32x96xf32, #tpu.memory_space<vmem>>, vector<32x96xf32>
    %cst_8 = arith.constant dense<0.000000e+00> : vector<16x96xf32>
    %21 = tpu.matmul %19, %20, %cst_8 {dimension_numbers = #tpu.dot_dimension_numbers<[1], [0], [0], [1], [0, 0, 1, 1], [], []>} : vector<16x32xf32>, vector<32x96xf32>, vector<16x96xf32> -> vector<16x96xf32>
    %c0_9 = arith.constant 0 : index
    %c0_10 = arith.constant 0 : index
    %22 = vector.load %arg4[%c0_9, %c0_10] : memref<1x96xf32, #tpu.memory_space<vmem>>, vector<1x96xf32>
    %23 = vector.broadcast %22 : vector<1x96xf32> to vector<16x96xf32>
    %24 = arith.addf %21, %23 : vector<16x96xf32>
    %25 = vector.extract_strided_slice %24 {offsets = [0, 0], sizes = [16, 32], strides = [1, 1]} : vector<16x96xf32> to vector<16x32xf32>
    %26 = vector.shape_cast %25 : vector<16x32xf32> to vector<2x8x32xf32>
    %27 = vector.extract_strided_slice %24 {offsets = [0, 32], sizes = [16, 32], strides = [1, 1]} : vector<16x96xf32> to vector<16x32xf32>
    %28 = vector.shape_cast %27 : vector<16x32xf32> to vector<2x8x32xf32>
    %29 = vector.extract_strided_slice %24 {offsets = [0, 64], sizes = [16, 32], strides = [1, 1]} : vector<16x96xf32> to vector<16x32xf32>
    %30 = vector.shape_cast %29 : vector<16x32xf32> to vector<2x8x32xf32>
    %31 = vector.extract_strided_slice %26 {offsets = [0, 0, 0], sizes = [2, 8, 8], strides = [1, 1, 1]} : vector<2x8x32xf32> to vector<2x8x8xf32>
    %32 = vector.extract_strided_slice %26 {offsets = [0, 0, 8], sizes = [2, 8, 8], strides = [1, 1, 1]} : vector<2x8x32xf32> to vector<2x8x8xf32>
    %33 = vector.extract_strided_slice %26 {offsets = [0, 0, 16], sizes = [2, 8, 8], strides = [1, 1, 1]} : vector<2x8x32xf32> to vector<2x8x8xf32>
    %34 = vector.extract_strided_slice %26 {offsets = [0, 0, 24], sizes = [2, 8, 8], strides = [1, 1, 1]} : vector<2x8x32xf32> to vector<2x8x8xf32>
    %35 = vector.shape_cast %31 : vector<2x8x8xf32> to vector<2x1x8x8xf32>
    %36 = vector.shape_cast %32 : vector<2x8x8xf32> to vector<2x1x8x8xf32>
    %37 = vector.shape_cast %33 : vector<2x8x8xf32> to vector<2x1x8x8xf32>
    %38 = vector.shape_cast %34 : vector<2x8x8xf32> to vector<2x1x8x8xf32>
    %39 = tpu.concatenate %35, %36, %37, %38 in 1 : vector<2x1x8x8xf32>, vector<2x1x8x8xf32>, vector<2x1x8x8xf32>, vector<2x1x8x8xf32> -> vector<2x4x8x8xf32>
    %40 = vector.shape_cast %39 : vector<2x4x8x8xf32> to vector<8x8x8xf32>
    %41 = vector.extract_strided_slice %28 {offsets = [0, 0, 0], sizes = [2, 8, 8], strides = [1, 1, 1]} : vector<2x8x32xf32> to vector<2x8x8xf32>
    %42 = vector.extract_strided_slice %28 {offsets = [0, 0, 8], sizes = [2, 8, 8], strides = [1, 1, 1]} : vector<2x8x32xf32> to vector<2x8x8xf32>
    %43 = vector.extract_strided_slice %28 {offsets = [0, 0, 16], sizes = [2, 8, 8], strides = [1, 1, 1]} : vector<2x8x32xf32> to vector<2x8x8xf32>
    %44 = vector.extract_strided_slice %28 {offsets = [0, 0, 24], sizes = [2, 8, 8], strides = [1, 1, 1]} : vector<2x8x32xf32> to vector<2x8x8xf32>
    %45 = vector.shape_cast %41 : vector<2x8x8xf32> to vector<2x1x8x8xf32>
    %46 = vector.shape_cast %42 : vector<2x8x8xf32> to vector<2x1x8x8xf32>
    %47 = vector.shape_cast %43 : vector<2x8x8xf32> to vector<2x1x8x8xf32>
    %48 = vector.shape_cast %44 : vector<2x8x8xf32> to vector<2x1x8x8xf32>
    %49 = tpu.concatenate %45, %46, %47, %48 in 1 : vector<2x1x8x8xf32>, vector<2x1x8x8xf32>, vector<2x1x8x8xf32>, vector<2x1x8x8xf32> -> vector<2x4x8x8xf32>
    %50 = vector.shape_cast %49 : vector<2x4x8x8xf32> to vector<8x8x8xf32>
    %51 = vector.extract_strided_slice %30 {offsets = [0, 0, 0], sizes = [2, 8, 8], strides = [1, 1, 1]} : vector<2x8x32xf32> to vector<2x8x8xf32>
    %52 = vector.extract_strided_slice %30 {offsets = [0, 0, 8], sizes = [2, 8, 8], strides = [1, 1, 1]} : vector<2x8x32xf32> to vector<2x8x8xf32>
    %53 = vector.extract_strided_slice %30 {offsets = [0, 0, 16], sizes = [2, 8, 8], strides = [1, 1, 1]} : vector<2x8x32xf32> to vector<2x8x8xf32>
    %54 = vector.extract_strided_slice %30 {offsets = [0, 0, 24], sizes = [2, 8, 8], strides = [1, 1, 1]} : vector<2x8x32xf32> to vector<2x8x8xf32>
    %55 = vector.shape_cast %51 : vector<2x8x8xf32> to vector<2x1x8x8xf32>
    %56 = vector.shape_cast %52 : vector<2x8x8xf32> to vector<2x1x8x8xf32>
    %57 = vector.shape_cast %53 : vector<2x8x8xf32> to vector<2x1x8x8xf32>
    %58 = vector.shape_cast %54 : vector<2x8x8xf32> to vector<2x1x8x8xf32>
    %59 = tpu.concatenate %55, %56, %57, %58 in 1 : vector<2x1x8x8xf32>, vector<2x1x8x8xf32>, vector<2x1x8x8xf32>, vector<2x1x8x8xf32> -> vector<2x4x8x8xf32>
    %60 = vector.shape_cast %59 : vector<2x4x8x8xf32> to vector<8x8x8xf32>
    %c0_11 = arith.constant 0 : index
    %c0_12 = arith.constant 0 : index
    %c0_13 = arith.constant 0 : index
    %61 = vector.load %arg2[%c0_11, %c0_12, %c0_13] : memref<8x1x8xf32, #tpu.memory_space<vmem>>, vector<8x1x8xf32>
    "tpu.trace_start"() <{level = 10 : i32, message = "bqd,bkd->bqk"}> : () -> ()
    %cst_14 = arith.constant dense<0.000000e+00> : vector<8x8x8xf32>
    %62 = tpu.matmul %40, %50, %cst_14 {dimension_numbers = #tpu.dot_dimension_numbers<[2], [2], [1], [1], [0, 0, 0, 1, 1, 1], [0], [0]>} : vector<8x8x8xf32>, vector<8x8x8xf32>, vector<8x8x8xf32> -> vector<8x8x8xf32>
    "tpu.trace_stop"() : () -> ()
    %63 = vector.broadcast %61 : vector<8x1x8xf32> to vector<8x8x8xf32>
    %64 = arith.addf %62, %63 : vector<8x8x8xf32>
    %cst_15 = arith.constant dense<0xFF800000> : vector<8x8xf32>
    %65 = vector.multi_reduction <maximumf>, %64, %cst_15 [2] : vector<8x8x8xf32> to vector<8x8xf32>
    %66 = vector.shape_cast %65 : vector<8x8xf32> to vector<8x8x1xf32>
    %cst_16 = arith.constant 0.000000e+00 : f32
    %67 = vector.broadcast %cst_16 : f32 to vector<8x8x1xf32>
    %68 = arith.maximumf %66, %67 : vector<8x8x1xf32>
    %69 = vector.broadcast %68 : vector<8x8x1xf32> to vector<8x8x8xf32>
    %70 = arith.subf %64, %69 : vector<8x8x8xf32>
    %71 = math.exp %70 : vector<8x8x8xf32>
    %cst_17 = arith.constant dense<0.000000e+00> : vector<8x8xf32>
    %72 = vector.multi_reduction <add>, %71, %cst_17 [2] : vector<8x8x8xf32> to vector<8x8xf32>
    %73 = vector.shape_cast %72 : vector<8x8xf32> to vector<8x8x1xf32>
    %cst_18 = arith.constant 0.000000e+00 : f32
    %74 = vector.broadcast %cst_18 : f32 to vector<8x8x1xf32>
    %75 = arith.subf %74, %68 : vector<8x8x1xf32>
    %76 = math.exp %75 : vector<8x8x1xf32>
    %77 = arith.addf %73, %76 : vector<8x8x1xf32>
    %78 = tpu.reciprocal %77 {approx = true} : vector<8x8x1xf32> -> vector<8x8x1xf32>
    "tpu.trace_start"() <{level = 10 : i32, message = "bqk,bkd->bqd"}> : () -> ()
    %cst_19 = arith.constant dense<0.000000e+00> : vector<8x8x8xf32>
    %79 = tpu.matmul %71, %60, %cst_19 {dimension_numbers = #tpu.dot_dimension_numbers<[2], [1], [1], [2], [0, 0, 0, 1, 1, 2], [0], [0]>} : vector<8x8x8xf32>, vector<8x8x8xf32>, vector<8x8x8xf32> -> vector<8x8x8xf32>
    "tpu.trace_stop"() : () -> ()
    %80 = vector.broadcast %78 : vector<8x8x1xf32> to vector<8x8x8xf32>
    %81 = arith.mulf %79, %80 : vector<8x8x8xf32>
    %82 = vector.shape_cast %81 : vector<8x8x8xf32> to vector<2x4x8x8xf32>
    %83 = vector.extract_strided_slice %82 {offsets = [0, 0, 0, 0], sizes = [2, 1, 8, 8], strides = [1, 1, 1, 1]} : vector<2x4x8x8xf32> to vector<2x1x8x8xf32>
    %84 = vector.shape_cast %83 : vector<2x1x8x8xf32> to vector<2x8x8xf32>
    %85 = vector.extract_strided_slice %82 {offsets = [0, 1, 0, 0], sizes = [2, 1, 8, 8], strides = [1, 1, 1, 1]} : vector<2x4x8x8xf32> to vector<2x1x8x8xf32>
    %86 = vector.shape_cast %85 : vector<2x1x8x8xf32> to vector<2x8x8xf32>
    %87 = vector.extract_strided_slice %82 {offsets = [0, 2, 0, 0], sizes = [2, 1, 8, 8], strides = [1, 1, 1, 1]} : vector<2x4x8x8xf32> to vector<2x1x8x8xf32>
    %88 = vector.shape_cast %87 : vector<2x1x8x8xf32> to vector<2x8x8xf32>
    %89 = vector.extract_strided_slice %82 {offsets = [0, 3, 0, 0], sizes = [2, 1, 8, 8], strides = [1, 1, 1, 1]} : vector<2x4x8x8xf32> to vector<2x1x8x8xf32>
    %90 = vector.shape_cast %89 : vector<2x1x8x8xf32> to vector<2x8x8xf32>
    %91 = tpu.concatenate %84, %86, %88, %90 in 2 : vector<2x8x8xf32>, vector<2x8x8xf32>, vector<2x8x8xf32>, vector<2x8x8xf32> -> vector<2x8x32xf32>
    %92 = vector.shape_cast %91 : vector<2x8x32xf32> to vector<16x32xf32>
    %c0_20 = arith.constant 0 : index
    %c0_21 = arith.constant 0 : index
    %93 = vector.load %arg5[%c0_20, %c0_21] : memref<32x32xf32, #tpu.memory_space<vmem>>, vector<32x32xf32>
    %cst_22 = arith.constant dense<0.000000e+00> : vector<16x32xf32>
    %94 = tpu.matmul %92, %93, %cst_22 {dimension_numbers = #tpu.dot_dimension_numbers<[1], [0], [0], [1], [0, 0, 1, 1], [], []>} : vector<16x32xf32>, vector<32x32xf32>, vector<16x32xf32> -> vector<16x32xf32>
    %c0_23 = arith.constant 0 : index
    %c0_24 = arith.constant 0 : index
    %95 = vector.load %arg6[%c0_23, %c0_24] : memref<1x32xf32, #tpu.memory_space<vmem>>, vector<1x32xf32>
    %96 = vector.broadcast %95 : vector<1x32xf32> to vector<16x32xf32>
    %97 = arith.addf %94, %96 : vector<16x32xf32>
    %98 = arith.addf %97, %1 : vector<16x32xf32>
    %c0_25 = arith.constant 0 : index
    %c0_26 = arith.constant 0 : index
    %99 = vector.load %arg7[%c0_25, %c0_26] : memref<32x32xf32, #tpu.memory_space<vmem>>, vector<32x32xf32>
    %cst_27 = arith.constant dense<0.000000e+00> : vector<16x32xf32>
    %100 = tpu.matmul %98, %99, %cst_27 {dimension_numbers = #tpu.dot_dimension_numbers<[1], [0], [0], [1], [0, 0, 1, 1], [], []>} : vector<16x32xf32>, vector<32x32xf32>, vector<16x32xf32> -> vector<16x32xf32>
    %c0_28 = arith.constant 0 : index
    %c0_29 = arith.constant 0 : index
    %101 = vector.load %arg8[%c0_28, %c0_29] : memref<1x32xf32, #tpu.memory_space<vmem>>, vector<1x32xf32>
    %102 = vector.broadcast %101 : vector<1x32xf32> to vector<16x32xf32>
    %103 = arith.addf %100, %102 : vector<16x32xf32>
    %cst_30 = arith.constant 0.000000e+00 : f32
    %104 = vector.broadcast %cst_30 : f32 to vector<16x32xf32>
    %105 = arith.maximumf %103, %104 : vector<16x32xf32>
    %cst_31 = arith.constant dense<0.000000e+00> : vector<16xf32>
    %106 = vector.multi_reduction <add>, %105, %cst_31 [1] : vector<16x32xf32> to vector<16xf32>
    %107 = vector.shape_cast %106 : vector<16xf32> to vector<16x1xf32>
    %cst_32 = arith.constant 3.200000e+01 : f32
    %108 = vector.broadcast %cst_32 : f32 to vector<16x1xf32>
    %109 = arith.divf %107, %108 : vector<16x1xf32>
    %110 = vector.broadcast %109 : vector<16x1xf32> to vector<16x32xf32>
    %111 = arith.subf %105, %110 : vector<16x32xf32>
    %112 = arith.mulf %111, %111 : vector<16x32xf32>
    %cst_33 = arith.constant dense<0.000000e+00> : vector<16xf32>
    %113 = vector.multi_reduction <add>, %112, %cst_33 [1] : vector<16x32xf32> to vector<16xf32>
    %114 = vector.shape_cast %113 : vector<16xf32> to vector<16x1xf32>
    %cst_34 = arith.constant 3.200000e+01 : f32
    %115 = vector.broadcast %cst_34 : f32 to vector<16x1xf32>
    %116 = arith.divf %114, %115 : vector<16x1xf32>
    %117 = vector.broadcast %109 : vector<16x1xf32> to vector<16x32xf32>
    %118 = arith.subf %105, %117 : vector<16x32xf32>
    %cst_35 = arith.constant 9.99999974E-6 : f32
    %119 = vector.broadcast %cst_35 : f32 to vector<16x1xf32>
    %120 = arith.addf %116, %119 : vector<16x1xf32>
    %121 = math.rsqrt %120 : vector<16x1xf32>
    %122 = vector.broadcast %121 : vector<16x1xf32> to vector<16x32xf32>
    %123 = arith.mulf %118, %122 : vector<16x32xf32>
    %c0_36 = arith.constant 0 : index
    %c0_37 = arith.constant 0 : index
    %124 = vector.load %arg9[%c0_36, %c0_37] : memref<1x32xf32, #tpu.memory_space<vmem>>, vector<1x32xf32>
    %125 = vector.broadcast %124 : vector<1x32xf32> to vector<16x32xf32>
    %126 = arith.mulf %123, %125 : vector<16x32xf32>
    %c0_38 = arith.constant 0 : index
    %c0_39 = arith.constant 0 : index
    %127 = vector.load %arg10[%c0_38, %c0_39] : memref<1x32xf32, #tpu.memory_space<vmem>>, vector<1x32xf32>
    %128 = vector.broadcast %127 : vector<1x32xf32> to vector<16x32xf32>
    %129 = arith.addf %126, %128 : vector<16x32xf32>
    %130 = vector.shape_cast %129 : vector<16x32xf32> to vector<2x8x32xf32>
    %c0_40 = arith.constant 0 : index
    %c0_41 = arith.constant 0 : index
    %c0_42 = arith.constant 0 : index
    %131 = vector.load %arg11[%c0_40, %c0_41, %c0_42] : memref<2x8x32xf32, #tpu.memory_space<vmem>>, vector<2x8x32xf32>
    tpu.vector_store %arg11[%c0_40, %c0_41, %c0_42], %130 {strides = array<i32>} : memref<2x8x32xf32, #tpu.memory_space<vmem>>, vector<2x8x32xf32>,
    return
  }
  func.func @transform_0(%arg0: i32) -> (i32, i32, i32) {
    %c0_i32 = arith.constant 0 : i32
    %c0_i32_0 = arith.constant 0 : i32
    %c0_i32_1 = arith.constant 0 : i32
    return %arg0, %c0_i32, %c0_i32_0 : i32, i32, i32
  }
  func.func @transform_1(%arg0: i32) -> (i32, i32, i32) {
    %c0_i32 = arith.constant 0 : i32
    %c0_i32_0 = arith.constant 0 : i32
    %c0_i32_1 = arith.constant 0 : i32
    return %arg0, %c0_i32, %c0_i32_0 : i32, i32, i32
  }
  func.func @transform_2(%arg0: i32) -> (i32, i32) {
    %c0_i32 = arith.constant 0 : i32
    %c0_i32_0 = arith.constant 0 : i32
    %c0_i32_1 = arith.constant 0 : i32
    return %c0_i32, %c0_i32_0 : i32, i32
  }
  func.func @transform_3(%arg0: i32) -> (i32, i32) {
    %c0_i32 = arith.constant 0 : i32
    %c0_i32_0 = arith.constant 0 : i32
    %c0_i32_1 = arith.constant 0 : i32
    return %c0_i32, %c0_i32_0 : i32, i32
  }
  func.func @transform_4(%arg0: i32) -> (i32, i32) {
    %c0_i32 = arith.constant 0 : i32
    %c0_i32_0 = arith.constant 0 : i32
    %c0_i32_1 = arith.constant 0 : i32
    return %c0_i32, %c0_i32_0 : i32, i32
  }
  func.func @transform_5(%arg0: i32) -> (i32, i32) {
    %c0_i32 = arith.constant 0 : i32
    %c0_i32_0 = arith.constant 0 : i32
    %c0_i32_1 = arith.constant 0 : i32
    return %c0_i32, %c0_i32_0 : i32, i32
  }
  func.func @transform_6(%arg0: i32) -> (i32, i32) {
    %c0_i32 = arith.constant 0 : i32
    %c0_i32_0 = arith.constant 0 : i32
    %c0_i32_1 = arith.constant 0 : i32
    return %c0_i32, %c0_i32_0 : i32, i32
  }
  func.func @transform_7(%arg0: i32) -> (i32, i32) {
    %c0_i32 = arith.constant 0 : i32
    %c0_i32_0 = arith.constant 0 : i32
    %c0_i32_1 = arith.constant 0 : i32
    return %c0_i32, %c0_i32_0 : i32, i32
  }
  func.func @transform_8(%arg0: i32) -> (i32, i32) {
    %c0_i32 = arith.constant 0 : i32
    %c0_i32_0 = arith.constant 0 : i32
    %c0_i32_1 = arith.constant 0 : i32
    return %c0_i32, %c0_i32_0 : i32, i32
  }
  func.func @transform_9(%arg0: i32) -> (i32, i32) {
    %c0_i32 = arith.constant 0 : i32
    %c0_i32_0 = arith.constant 0 : i32
    %c0_i32_1 = arith.constant 0 : i32
    return %c0_i32, %c0_i32_0 : i32, i32
  }
  func.func @transform_10(%arg0: i32) -> (i32, i32, i32) {
    %c0_i32 = arith.constant 0 : i32
    %c0_i32_0 = arith.constant 0 : i32
    %c0_i32_1 = arith.constant 0 : i32
    return %arg0, %c0_i32, %c0_i32_0 : i32, i32, i32
  }
}

</mosaic_0001>

<bundles_post_ra>
// kernel: self_att_layer_enc.1
= control target key start
LH: loop header
LB: loop body
LE: loop exit
PB: predicated region body
PF: predicated region fallthrough
CT: control target
= control target key end

     0   :  { %15 = vsyncpa [#allocation3], 0  ;;  %s3456_s0 = inlined_call_operand.hbm [shape: f32[4,8,32], index: 0, kind: input, shape index: {}]   ;;  %s3457_s1 = inlined_call_operand.vmem [shape: f32[16,1,8], index: 1, kind: input, shape index: {}]   ;;  %s3458_s2 = inlined_call_operand.vmem [shape: f32[32,96], index: 2, kind: input, shape index: {}]   ;;  %s3459_s3 = inlined_call_operand.vmem [shape: f32[1,96], index: 3, kind: input, shape index: {}]   ;;  %s3460_s4 = inlined_call_operand.hbm [shape: f32[32,32], index: 4, kind: input, shape index: {}]   ;;  %s3461_s5 = inlined_call_operand.vmem [shape: f32[1,32], index: 5, kind: input, shape index: {}]   ;;  %s3462_s6 = inlined_call_operand.hbm [shape: f32[32,32], index: 6, kind: input, shape index: {}]   ;;  %s3463_s7 = inlined_call_operand.vmem [shape: f32[1,32], index: 7, kind: input, shape index: {}]   ;;  %s3464_s8 = inlined_call_operand.vmem [shape: f32[1,32], index: 8, kind: input, shape index: {}]   ;;  %s3465_s9 = inlined_call_operand.vmem [shape: f32[1,32], index: 9, kind: input, shape index: {}]   ;;  %s3466_s10 = inlined_call_operand.hbm [shape: f32[4,8,32], index: 10, kind: output, shape index: {}]  }
   0x1   :  { %17 = vsyncpa [#allocation3 + $0x1], 0 }
   0x2   :  { %18 = vsyncpa [#allocation6], 0 }
   0x3   :  { %19 = vsyncpa [#allocation4], 0 }
   0x4   :  { %21 = vsyncpa [#allocation4 + $0x1], 0  ;;  %s2963_s13 = smov 0   ;;  %s2965_s14 = smov 0  }
   0x5   :  { %s2967_s15 = smov 0   ;;  %s2969_s16 = smov 0  }
   0x6 LB: > { %3474 = sst [smem:[#allocation12_spill]] %s2877_s13  ;;  %s2984_s17 = sadd.s32 4294967295, %s2889_s16   ;;  %s2889_s16 = sphi %s2969_s16, %s3496_s16   ;;  %s2885_s15 = sphi %s2967_s15, %s3495_s15   ;;  %s2881_s14 = sphi %s2965_s14, %s3494_s14   ;;  %s2877_s13 = sphi %s2963_s13, %s3493_s13  }
   0x7   : > { %s2346_s18 = sadd.s32 4294967294, %s2889_s16   ;;  %p47_p0 = scmp.ne.s32.totalorder %s2881_s14, %s2877_s13 }
   0x8   : > { %p3467_p1 = scmp.eq.s32.totalorder %s2984_s17, 0  ;;  %p271_p3 = scmp.eq.s32.totalorder %s2346_s18, 1 }
   0x9   : > { %p2347_p5 = scmp.ge.s32.totalorder %s2889_s16, 1  ;;  %p278_p7 = scmp.lt.s32.totalorder %s2889_s16, 3 }
   0xa   : > { %p2993_p4 = por %p3467_p1, %p47_p0  ;;  %p2998_p6 = por %p271_p3, %p47_p0 }
   0xb   : > { %p3003_p8 = pnand %p2347_p5, %p278_p7  ;;  %s2891_s22 = smov [#allocation5]  }
   0xc   : > { %s3475_s19 = scalar_select %p2993_p4, 1, 0 }
   0xd   : > { %s3476_s20 = scalar_select %p2998_p6, 1, 0 }
   0xe   : > { %s296_s23 = sshll.u32 %s2891_s22, 4  ;;  %p2609_p9 = pneg %p3003_p8  ;;  %s3007_s23 = int_to_ptr.vmem [resolvable:$true] %s296_s23 }
   0xf   : > { %3477 = sst [smem:[#allocation13_spill]] %s3476_s20  ;;  %s2892_s25 = smov [#allocation7]  }
  0x10   : > { %p3014_p11 = pnand %p2609_p9, %p3467_p1  ;;  %s312_s26 = sshll.u32 %s2892_s25, 4  ;;  %s3018_s26 = int_to_ptr.vmem [resolvable:$true] %s312_s26 }
  0x11   : > { %s2733_s29 = scalar_lea.hbm %s3460_s4, 512 }
  0x12   : > { %p2734_p12 = scmp.ne.s32.totalorder %s3460_s4, %s2733_s29  ;;  %p2735_p13 = pneg %p3014_p11 }
  0x13   : > { %p2740_p5 = scmp.lt.u32.totalorder %s2733_s29, %s3460_s4 }
  0x14   : > { %p2736_p0 = pnand %p2735_p13, %p2734_p12 }
  0x16   : > { %p2737_p3 = pneg %p2736_p0 }
  0x18   : > { %p2742_p7 = pnand %p2740_p5, %p2737_p3 }
  0x1a   : > { %2745 = shalt.err (!%p2742_p7)
}
  0x1b   : > { %s2746_s22 = scalar_lea.vmem %s3007_s23, 512  ;;  %p2754_p2 = scmp.lt.s32.totalorder %s3007_s23, %s3007_s23 }
  0x1c   : > { %p2747_p9 = scmp.ne.s32.totalorder %s3007_s23, %s2746_s22  ;;  %p2755_p12 = scmp.lt.s32.totalorder %s2746_s22, %s2746_s22 }
  0x1e   : > { %p2749_p10 = pnand %p2747_p9, %p2735_p13  ;;  %p2756_p0 = por %p2755_p12, %p2754_p2 }
  0x20   : > { %p2750_p1 = pneg %p2749_p10 }
  0x22   : > { %p2757_p6 = pnand %p2756_p0, %p2750_p1 }
  0x24   : > { %2760 = shalt.err (!%p2757_p6)
}
  0x25   : > { %s3470_s25 = smov 128   ;;  %s3471_s27 = smov 8  }
  0x26   : > { %2612 = dma.hbm_to_vmem [thread:$0]  (!%p3014_p11), %s3460_s4, 512, %s3007_s23, [#allocation6], %s3470_s25, %s3470_s25, %s3471_s27  }
  0x27   : > { %s2761_s12 = scalar_lea.hbm %s3462_s6, 512 }
  0x28   : > { %p2762_p1 = scmp.ne.s32.totalorder %s3462_s6, %s2761_s12  ;;  %p2768_p10 = scmp.lt.u32.totalorder %s2761_s12, %s3462_s6 }
  0x2a   : > { %p2764_p2 = pnand %p2762_p1, %p2735_p13 }
  0x2c   : > { %p2765_p6 = pneg %p2764_p2 }
  0x2e   : > { %p2770_p3 = pnand %p2768_p10, %p2765_p6 }
  0x30   : > { %2773 = shalt.err (!%p2770_p3)
}
  0x31   : > { %s2774_s23 = scalar_lea.vmem %s3018_s26, 512  ;;  %p2782_p12 = scmp.lt.s32.totalorder %s3018_s26, %s3018_s26 }
  0x32   : > { %p2775_p5 = scmp.ne.s32.totalorder %s3018_s26, %s2774_s23  ;;  %p2783_p0 = scmp.lt.s32.totalorder %s2774_s23, %s2774_s23 }
  0x34   : > { %p2777_p7 = pnand %p2775_p5, %p2735_p13  ;;  %p2784_p1 = por %p2783_p0, %p2782_p12 }
  0x36   : > { %p2778_p9 = pneg %p2777_p7 }
  0x38   : > { %p2785_p2 = pnand %p2784_p1, %p2778_p9 }
  0x3a   : > { %2788 = shalt.err (!%p2785_p2)
}
  0x3b   : > { %2615 = dma.hbm_to_vmem [thread:$0]  (!%p3014_p11), %s3462_s6, 512, %s3018_s26, [#allocation6], %s3470_s25, %s3470_s25, %s3471_s27  }
  0x3c   : > { %s3079_s24 = sadd.s32 1, %s2889_s16   ;;  %s34_s28 = sadd.s32 1, %s2885_s15 }
  0x3d   : > { %s31_s29 = ssub.s32 %s2889_s16, %s3079_s24  ;;  %p41_p13 = scmp.ne.s32.totalorder %s2885_s15, %s2881_s14 }
  0x3e   : > { %p32_p6 = scmp.eq.s32.totalorder %s31_s29, 0  ;;  %p42_p10 = scmp.eq.s32.totalorder %s2889_s16, 0 }
  0x3f   : > { %p3480_p3 = scmp.eq.s32.totalorder %s2984_s17, 1  ;;  %p2626_p7 = scmp.lt.s32.totalorder %s2889_s16, 2 }
  0x40   : > { %s3095_s11 = scalar_select %p32_p6, %s2885_s15, %s34_s28  }
  0x41   : > { %p3089_p5 = por %p3480_p3, %p41_p13  ;;  %p43_p9 = por %p42_p10, %p41_p13 }
  0x42   : > { %s335_s12 = sand.u32 1, %s2885_s15   ;;  %s2408_s26 = sshll.u32 %s2889_s16, 8 }
  0x43   : > { %s3481_s30 = scalar_select %p3089_p5, 1, 0 }
  0x44   : > { %s2351_s18 = sshll.u32 %s335_s12, 4  ;;  %s3102_s13 = scalar_lea.hbm %s3456_s0, %s2408_s26 }
  0x45   : > { %s339_s20 = scalar_lea.vmem [#allocation2], %s2351_s18  ;;  %p3106_p11 = pnand %p2626_p7, %p43_p9 }
  0x46   : > { %s346_s29 = sshll.u32 %s339_s20, 4  ;;  %s3110_s25 = scalar_lea.sflag [#allocation3], %s335_s12  ;;  %s3104_s29 = int_to_ptr.vmem [resolvable:$true] %s346_s29 }
  0x47   : > { %s2789_s27 = scalar_lea.hbm %s3102_s13, 256  ;;  %p2791_p0 = pneg %p3106_p11 }
  0x48   : > { %p2790_p12 = scmp.ne.s32.totalorder %s3102_s13, %s2789_s27  ;;  %s2794_s22 = scalar_lea.hbm %s3456_s0, 512 }
  0x49   : > { %p2795_p13 = scmp.lt.u32.totalorder %s3102_s13, %s3456_s0  ;;  %p2796_p6 = scmp.lt.u32.totalorder %s2794_s22, %s2789_s27 }
  0x4a   : > { %p2792_p1 = pnand %p2791_p0, %p2790_p12  ;;  %p2798_p3 = scmp.lt.u32.totalorder %s2789_s27, %s3102_s13 }
  0x4b   : > { %p2797_p10 = por %p2796_p6, %p2795_p13 }
  0x4c   : > { %p2793_p2 = pneg %p2792_p1 }
  0x4d   : > { %p2799_p7 = por %p2798_p3, %p2797_p10 }
  0x4f   : > { %p2800_p9 = pnand %p2799_p7, %p2793_p2 }
  0x51   : > { %2803 = shalt.err (!%p2800_p9)
}
  0x52   : > { %s2804_s12 = scalar_lea.vmem %s3104_s29, 256  ;;  %s2895_s18 = smov [#allocation2]  }
  0x53   : > { %p2805_p12 = scmp.ne.s32.totalorder %s3104_s29, %s2804_s12  ;;  %s2809_s26 = sshll.u32 %s2895_s18, 4  ;;  %s2810_s26 = int_to_ptr.vmem [resolvable:$false] %s2809_s26 }
  0x54   : > { %s2811_s23 = scalar_lea.vmem %s2810_s26, 512  ;;  %p2812_p4 = scmp.lt.s32.totalorder %s3104_s29, %s2810_s26 }
  0x55   : > { %p2807_p1 = pnand %p2805_p12, %p2791_p0  ;;  %p2813_p13 = scmp.lt.s32.totalorder %s2811_s23, %s2804_s12 }
  0x57   : > { %p2808_p5 = pneg %p2807_p1  ;;  %p2814_p6 = por %p2813_p13, %p2812_p4 }
  0x59   : > { %p2815_p10 = pnand %p2814_p6, %p2808_p5 }
  0x5b   : > { %2818 = shalt.err (!%p2815_p10)
}
  0x5c   : > { %s3483_s27 = smov 8   ;;  %s3484_s22 = smov 128  }
  0x5d   : > { %2619 = dma.hbm_to_vmem [thread:$0]  (!%p3106_p11), %s3102_s13, 256, %s3104_s29, %s3110_s25, %s3484_s22, %s3484_s22, %s3483_s27  }
  0x5e   : > { %366 = sbr.rel (%p3003_p8) target bundleno = 2356 (0x934), region = 60  ;;  %s3144_s20 = sand.u32 (!%p3003_p8), 1, %s2881_s14  }
  0x5f   : > { %s2355_s12 = sshll.u32 (!%p3003_p8), %s3144_s20, 4  ;;  %s369_s18 = scalar_lea.sflag (!%p3003_p8), [#allocation3], %s3144_s20 }
  0x60   : > { %s372_s28 = scalar_lea.vmem (!%p3003_p8), [#allocation2], %s2355_s12  ;;  %p3485_p4 = scmp.ne.s32.totalorder (!%p3003_p8), %s3475_s19, 0 }
  0x65   : > { %2864 = dma.done.wait (%p3485_p4), %s369_s18, 256  }
  0x66   : > { %2866 = vsyncadd (%p3485_p4), %s369_s18, 4294967040  ;;  %p3486_p5 = scmp.eq.s32.totalorder %s2984_s17, 0 }
  0x68   : > { %2868 = dma.done.wait (%p3486_p5), [#allocation6], 1024   ;;  %p3487_p8 = pmov %p3486_p5 }
  0x69   : > { %vm430_vm0 = vcmask 261120   ;;  %v3158_v0 = vld [vmem:[%s372_s28] sm:$0xff]  ;;  %v3160_v1 = vld [vmem:[%s372_s28 + $0x8] sm:$0xff]  ;;  %v2896_v30 = vmov 0.0   ;;  %vm2897_vm1 = vmmov 0   ;;  %s2898_s28 = smov 112  }
  0x6a   : > { %2870 = vsyncadd (%p3487_p8), [#allocation6], 4294966272  ;;  %v431_v2 = vsel %vm430_vm0, %v3158_v0, 0.0  ;;  %v434_v3 = vsel %vm430_vm0, %v3160_v1, 0.0  ;;  %v458_v14 = vld [vmem:[%s3458_s2] sm:$0xff]  ;;  %v459_v15 = vld [vmem:[%s3458_s2 + $0x8] sm:$0xff]  ;;  %2471 = vmatprep.subr.mxu1 %v2896_v30  ;;  %2473 = vmatprep.mubr.msk.f32.mxu1 %vm2897_vm1, %v2896_v30 }
  0x6b   : > { %432 = vadd.xlane.f32.xlu0 %v431_v2  ;;  %v460_v16 = vld [vmem:[%s3458_s2 + $0x10] sm:$0xff]  ;;  %v2573_v17 = vpack.c.bf16 %v459_v15, %v458_v14  ;;  %v461_v18 = vld [vmem:[%s3458_s2 + $0x18] sm:$0xff]  ;;  %v2360_v31 = vld [vmem:[%s3459_s3] ss:$0 sm:$0xff]  ;;  %s2899_s19 = smov 120   ;;  %s2900_s21 = smov 104  }
  0x6c   : > { %v2577_v19 = vpack.c.bf16 %v461_v18, %v460_v16  ;;  %s2901_s25 = smov 96   ;;  %vm622_vm2 = vcmask 64512   ;;  %s2902_s13 = smov 64   ;;  %vm1991_vm3 = vcmask 130048   ;;  %vm1994_vm4 = vcmask 195584  }
  0x6d   : > { %2574 = vmatprep.subr.bf16.mxu0 %v2573_v17  ;;  %s2359_s29 = sshll.u32 %s2984_s17, 3  ;;  %s2903_s22 = smov 8  }
  0x6e   : > { %2576 = vmatpush3.bf16.msra.mxu0 %v2573_v17  ;;  %p423_p11 = scmp.lt.s32.totalorder %s2359_s29, 15  ;;  %s2904_s18 = smov 16  }
  0x6f   : > { %435 = vadd.xlane.f32.xlu0 %v434_v3  ;;  %2578 = vmatprep.subr.bf16.mxu0 %v2577_v19  ;;  %p3488_p2 = scmp.ne.s32.totalorder %s3481_s30, 0 }
  0x70   : > { %s3498_s29 = smov (!%p423_p11, %s2359_s29), 15 }
  0x71   : > { %s3255_s27 = scalar_lea.vmem %s3457_s1, %s3498_s29 }
  0x72   : > { %2580 = vmatpush3.bf16.msra.mxu0 %v2577_v19  ;;  %v2363_v53 = vld [vmem:[%s3255_s27] ss:$0 sm:$0xff]  ;;  %v2364_v58 = vld [vmem:[%s3255_s27 + $0x1] ss:$0 sm:$0xff]  ;;  %v2365_v59 = vld [vmem:[%s3255_s27 + $0x2] ss:$0 sm:$0xff] }
  0x73   : > { %2481 = vmatprep.subr.mxu0 %v2896_v30  ;;  %v2369_v17 = vld [vmem:[%s3255_s27 + $0x6] ss:$0 sm:$0xff] }
  0xf8   : > { %v433_v4 = vpop.xlane.xlu0 %432 }
  0xf9   : > { %v438_v5 = vmul.f32 0.03125, %v433_v4  ;;  %v2366_v4 = vld [vmem:[%s3255_s27 + $0x3] ss:$0 sm:$0xff] }
  0xfb   : > { %v440_v6 = vsub.f32 %v3158_v0, %v438_v5 }
  0xfc   : > { %v436_v7 = vpop.xlane.xlu0 %435 }
  0xfd   : > { %v439_v8 = vmul.f32 0.03125, %v436_v7  ;;  %v442_v9 = vmul.f32 %v440_v6, %v440_v6 }
  0xff   : > { %v441_v10 = vsub.f32 %v3160_v1, %v439_v8  ;;  %v444_v11 = vsel %vm430_vm0, %v442_v9, 0.0  ;;  %v2367_v8 = vld [vmem:[%s3255_s27 + $0x4] ss:$0 sm:$0xff] }
 0x100   : > { %445 = vadd.xlane.f32.xlu1 %v444_v11 }
 0x101   : > { %v443_v12 = vmul.f32 %v441_v10, %v441_v10 }
 0x103   : > { %v447_v13 = vsel %vm430_vm0, %v443_v12, 0.0 }
 0x104   : > { %448 = vadd.xlane.f32.xlu1 %v447_v13  ;;  %v2368_v13 = vld [vmem:[%s3255_s27 + $0x5] ss:$0 sm:$0xff] }
 0x18d   : > { %v446_v20 = vpop.xlane.xlu1 %445 }
 0x18e   : > { %v450_v21 = vmul.f32 0.03125, %v446_v20 }
 0x190   : > { %v452_v22 = vadd.f32 1e-05, %v450_v21 }
 0x191   : > { %v449_v23 = vpop.xlane.xlu1 %448 }
 0x192   : > { %2677 = vrsqrt.f32 %v452_v22  ;;  %v451_v24 = vmul.f32 0.03125, %v449_v23  ;;  %v2370_v22 = vld [vmem:[%s3255_s27 + $0x7] ss:$0 sm:$0xff] }
 0x194   : > { %v453_v25 = vadd.f32 1e-05, %v451_v24 }
 0x196   : > { %2679 = vrsqrt.f32 %v453_v25 }
 0x19c   : > { %v2678_v26 = vpop.eup %2677 }
 0x19d   : > { %v456_v27 = vmul.f32 %v2678_v26, %v440_v6 }
 0x19f   : > { %2468 = vmatprep.mubr.msk.f32.mxu0 %vm430_vm0, %v456_v27 }
 0x1a0   : > { %v2680_v28 = vpop.eup %2679 }
 0x1a1   : > { %v457_v29 = vmul.f32 %v2680_v28, %v441_v10 }
 0x1a3   : > { %2469 = vmatmul.mubr.msk.f32.vlgmr.msra.gmra.mrb[0].mxu0 %vm430_vm0, %v457_v29 }
 0x1a4   : > { %2483 = vmatprep.mubr.msk.f32.mxu0 %vm2897_vm1, %v2896_v30 }
 0x276   : > { %v2470_v32 = vpop.f32.mrb[0].mxu0 }
 0x277   : > { %v541_v33 = vpop.f32.mrb[1].mxu0  ;;  %v547_v35 = vadd.f32 %v2470_v32, %v2360_v31 }
 0x278   : > { %v542_v34 = vadd.f32 %v2360_v31, %v541_v33 }
 0x27a   : > { %556 = vrot.lane.b32.xlu1 %v542_v34, %s2898_s28  ;;  %552 = vrot.lane.b32.xlu0 %v542_v34, %s2899_s19 }
 0x27e   : > { %560 = vrot.lane.b32.xlu1 %v542_v34, %s2900_s21  ;;  %558 = vrot.lane.b32.xlu0 %v547_v35, %s2898_s28  ;;  %s2905_s28 = smov 24  }
 0x282   : > { %554 = vrot.lane.b32.xlu1 %v547_v35, %s2899_s19  ;;  %620 = vrot.lane.b32.xlu0 %v542_v34, %s2901_s25 }
 0x286   : > { %562 = vrot.lane.b32.xlu1 %v547_v35, %s2900_s21 }
 0x2ec   : > { %v557_v36 = vpop.permute.xlu1 %556  ;;  %v553_v37 = vpop.permute.xlu0 %552 }
 0x2ed   : > { %773 = vrot.lane.b32.xlu0 %v557_v36, %s2901_s25  ;;  %697 = vrot.lane.b32.xlu1 %v553_v37, %s2901_s25 }
 0x2f0   : > { %v561_v38 = vpop.permute.xlu1 %560  ;;  %v3193_v39 = vpop.permute.xlu0 %558 }
 0x2f1   : > { %925 = vrot.lane.b32.xlu0 %v547_v35, %s2901_s25  ;;  %849 = vrot.lane.b32.xlu1 %v561_v38, %s2901_s25 }
 0x2f4   : > { %v555_v40 = vpop.permute.xlu1 %554  ;;  %v621_v41 = vpop.permute.xlu0 %620 }
 0x2f5   : > { %1001 = vrot.lane.b32.xlu1 %v555_v40, %s2901_s25  ;;  %1077 = vrot.lane.b32.xlu0 %v3193_v39, %s2901_s25 }
 0x2f6   : > { %2472 = vmatpush3.xpose.msk.msra.mxu1 %vm622_vm2, %v621_v41 }
 0x2f7   : > { %2476 = vmatprep.subr.mxu1 %v2896_v30 }
 0x2f8   : > { %v3198_v42 = vpop.permute.xlu1 %562 }
 0x2f9   : > { %2474 = vmatmul.mubr.msk.f32.vlgmr.msra.gmra.mrb[0].mxu1 %vm622_vm2, %v542_v34  ;;  %1153 = vrot.lane.b32.xlu1 %v3198_v42, %s2901_s25 }
 0x2fa   : > { %1349 = vrot.lane.b32.xlu0 %v542_v34, %s2902_s13  ;;  %2478 = vmatprep.mubr.msk.f32.mxu1 %vm2897_vm1, %v2896_v30 }
 0x2fd   : > { %1729 = vrot.lane.b32.xlu1 %v555_v40, %s2902_s13 }
 0x2fe   : > { %1653 = vrot.lane.b32.xlu0 %v547_v35, %s2902_s13 }
 0x301   : > { %1425 = vrot.lane.b32.xlu1 %v553_v37, %s2902_s13 }
 0x305   : > { %1501 = vrot.lane.b32.xlu1 %v557_v36, %s2902_s13 }
 0x309   : > { %1577 = vrot.lane.b32.xlu1 %v561_v38, %s2902_s13 }
 0x35f   : > { %v698_v43 = vpop.permute.xlu1 %697  ;;  %v774_v44 = vpop.permute.xlu0 %773 }
 0x360   : > { %2477 = vmatpush3.xpose.msk.msra.mxu1 %vm622_vm2, %v698_v43  ;;  %2482 = vmatpush3.xpose.msk.msra.mxu0 %vm622_vm2, %v774_v44 }
 0x361   : > { %2486 = vmatprep.subr.mxu1 %v2896_v30  ;;  %2491 = vmatprep.subr.mxu0 %v2896_v30 }
 0x363   : > { %v850_v45 = vpop.permute.xlu1 %849  ;;  %2479 = vmatmul.mubr.msk.f32.vlgmr.msra.gmra.mrb[2].mxu1 %vm622_vm2, %v553_v37  ;;  %2484 = vmatmul.mubr.msk.f32.vlgmr.msra.gmra.mrb[2].mxu0 %vm622_vm2, %v557_v36  ;;  %v926_v46 = vpop.permute.xlu0 %925 }
 0x364   : > { %2487 = vmatpush3.xpose.msk.msra.mxu1 %vm622_vm2, %v850_v45  ;;  %2492 = vmatpush3.xpose.msk.msra.mxu0 %vm622_vm2, %v926_v46 }
 0x365   : > { %2488 = vmatprep.mubr.msk.f32.mxu1 %vm2897_vm1, %v2896_v30  ;;  %2493 = vmatprep.mubr.msk.f32.mxu0 %vm2897_vm1, %v2896_v30 }
 0x366   : > { %2496 = vmatprep.subr.mxu1 %v2896_v30  ;;  %2501 = vmatprep.subr.mxu0 %v2896_v30 }
 0x367   : > { %v1002_v47 = vpop.permute.xlu1 %1001  ;;  %2489 = vmatmul.mubr.msk.f32.vlgmr.msra.gmra.mrb[4].mxu1 %vm622_vm2, %v561_v38  ;;  %2494 = vmatmul.mubr.msk.f32.vlgmr.msra.gmra.mrb[4].mxu0 %vm622_vm2, %v547_v35  ;;  %v1078_v48 = vpop.permute.xlu0 %1077 }
 0x368   : > { %2497 = vmatpush3.xpose.msk.msra.mxu1 %vm622_vm2, %v1002_v47  ;;  %2502 = vmatpush3.xpose.msk.msra.mxu0 %vm622_vm2, %v1078_v48 }
 0x369   : > { %2498 = vmatprep.mubr.msk.f32.mxu1 %vm2897_vm1, %v2896_v30  ;;  %2503 = vmatprep.mubr.msk.f32.mxu0 %vm2897_vm1, %v2896_v30 }
 0x36a   : > { %2506 = vmatprep.subr.mxu1 %v2896_v30  ;;  %2511 = vmatprep.subr.mxu0 %v2896_v30 }
 0x36b   : > { %v1154_v49 = vpop.permute.xlu1 %1153  ;;  %2499 = vmatmul.mubr.msk.f32.vlgmr.msra.gmra.mrb[6].mxu1 %vm622_vm2, %v555_v40  ;;  %2504 = vmatmul.mubr.msk.f32.vlgmr.msra.gmra.mrb[6].mxu0 %vm622_vm2, %v3193_v39 }
 0x36c   : > { %v1350_v50 = vpop.permute.xlu0 %1349  ;;  %2507 = vmatpush3.xpose.msk.msra.mxu1 %vm622_vm2, %v1154_v49  ;;  %2508 = vmatprep.mubr.msk.f32.mxu1 %vm2897_vm1, %v2896_v30 }
 0x36d   : > { %2512 = vmatpush3.msra.mxu0 %v1350_v50  ;;  %2516 = vmatprep.subr.mxu1 %v2896_v30 }
 0x36e   : > { %2513 = vmatprep.mubr.msk.f32.mxu0 %vm2897_vm1, %v2896_v30  ;;  %2521 = vmatprep.subr.mxu0 %v2896_v30 }
 0x36f   : > { %v3244_v51 = vpop.permute.xlu1 %1729  ;;  %2509 = vmatmul.mubr.msk.f32.vlgmr.msra.gmra.mrb[8].mxu1 %vm622_vm2, %v3198_v42 }
 0x370   : > { %2518 = vmatprep.mubr.msk.f32.mxu1 %vm2897_vm1, %v2896_v30  ;;  %v1654_v32 = vpop.permute.xlu0 %1653 }
 0x373   : > { %v1426_v52 = vpop.permute.xlu1 %1425 }
 0x374   : > { %2517 = vmatpush3.msra.mxu1 %v1426_v52 }
 0x375   : > { %2526 = vmatprep.subr.mxu1 %v2896_v30 }
 0x377   : > { %v1502_v38 = vpop.permute.xlu1 %1501 }
 0x3cc   : > { %v693_v54 = vpop.f32.mrb[0].mxu1 }
 0x3cd   : > { %v694_v55 = vadd.f32 %v2363_v53, %v693_v54  ;;  %v2475_v56 = vpop.f32.mrb[1].mxu1 }
 0x3cf   : > { %v1229_v57 = vsel %vm622_vm2, %v694_v55, -inf }
 0x3d0   : > { %1230 = vmax.xlane.f32.xlu0 %v1229_v57 }
 0x436   : > { %v769_v60 = vpop.f32.mrb[2].mxu1  ;;  %v845_v61 = vpop.f32.mrb[2].mxu0 }
 0x437   : > { %v770_v62 = vadd.f32 %v2364_v58, %v769_v60  ;;  %v846_v63 = vadd.f32 %v2365_v59, %v845_v61  ;;  %v2480_v2 = vpop.f32.mrb[3].mxu1  ;;  %v2485_v3 = vpop.f32.mrb[3].mxu0 }
 0x439   : > { %v1232_v5 = vsel %vm622_vm2, %v770_v62, -inf  ;;  %v1235_v6 = vsel %vm622_vm2, %v846_v63, -inf }
 0x43a   : > { %1233 = vmax.xlane.f32.xlu1 %v1232_v5  ;;  %v921_v7 = vpop.f32.mrb[4].mxu1  ;;  %1236 = vmax.xlane.f32.xlu0 %v1235_v6  ;;  %v997_v9 = vpop.f32.mrb[4].mxu0 }
 0x43b   : > { %v922_v10 = vadd.f32 %v2366_v4, %v921_v7  ;;  %v2490_v11 = vpop.f32.mrb[5].mxu1  ;;  %v2495_v12 = vpop.f32.mrb[5].mxu0  ;;  %v998_v14 = vadd.f32 %v2367_v8, %v997_v9 }
 0x43d   : > { %v1238_v15 = vsel %vm622_vm2, %v922_v10, -inf  ;;  %v1241_v25 = vsel %vm622_vm2, %v998_v14, -inf }
 0x43e   : > { %v1073_v16 = vpop.f32.mrb[6].mxu1  ;;  %1239 = vmax.xlane.f32.xlu0 %v1238_v15  ;;  %v1149_v18 = vpop.f32.mrb[6].mxu0 }
 0x43f   : > { %v1074_v19 = vadd.f32 %v2368_v13, %v1073_v16  ;;  %v2500_v20 = vpop.f32.mrb[7].mxu1  ;;  %v2505_v21 = vpop.f32.mrb[7].mxu0  ;;  %v1150_v23 = vadd.f32 %v2369_v17, %v1149_v18 }
 0x441   : > { %v1244_v24 = vsel %vm622_vm2, %v1074_v19, -inf  ;;  %v1247_v31 = vsel %vm622_vm2, %v1150_v23, -inf }
 0x442   : > { %1245 = vmax.xlane.f32.xlu1 %v1244_v24  ;;  %v1225_v26 = vpop.f32.mrb[8].mxu1  ;;  %1242 = vmax.xlane.f32.xlu0 %v1241_v25 }
 0x443   : > { %v1226_v27 = vadd.f32 %v2370_v22, %v1225_v26  ;;  %v2510_v28 = vpop.f32.mrb[9].mxu1 }
 0x445   : > { %v1250_v29 = vsel %vm622_vm2, %v1226_v27, -inf }
 0x446   : > { %1251 = vmax.xlane.f32.xlu1 %v1250_v29  ;;  %1248 = vmax.xlane.f32.xlu0 %v1247_v31 }
 0x457   : > { %1881 = vrot.lane.b32.xlu1 %v3198_v42, %s2902_s13 }
 0x45c   : > { %1805 = vrot.lane.b32.xlu0 %v3193_v39, %s2902_s13  ;;  %v1578_v39 = vpop.permute.xlu1 %1577 }
 0x45d   : > { %v3277_v33 = vpop.xlane.xlu0 %1230 }
 0x45e   : > { %v1253_v34 = vmax.f32 %v3277_v33, 0.0 }
 0x460   : > { %v1261_v35 = vsub.f32 %v694_v55, %v1253_v34  ;;  %v1309_v24 = vsub.f32 0.0, %v1253_v34 }
 0x462   : > { %v1269_v36 = vmul.f32 1.442695, %v1261_v35  ;;  %v1317_v26 = vmul.f32 1.442695, %v1309_v24 }
 0x464   : > { %2681 = vpow2.f32 %v1269_v36 }
 0x46e   : > { %v3282_v37 = vpop.eup %2681 }
 0x46f   : > { %2514 = vmatmul.mubr.msk.f32.vlgmr.msra.gmra.mrb[8].mxu0 %vm622_vm2, %v3282_v37  ;;  %v1285_v22 = vsel %vm622_vm2, %v3282_v37, 0.0 }
 0x470   : > { %2522 = vmatpush3.msra.mxu0 %v1502_v38  ;;  %2523 = vmatprep.mubr.msk.f32.mxu0 %vm2897_vm1, %v2896_v30 }
 0x471   : > { %2531 = vmatprep.subr.mxu0 %v2896_v30 }
 0x4c7   : > { %v3289_v40 = vpop.xlane.xlu1 %1233  ;;  %v3291_v41 = vpop.xlane.xlu0 %1236 }
 0x4c8   : > { %v1254_v42 = vmax.f32 %v3289_v40, 0.0  ;;  %v1255_v43 = vmax.f32 %v3291_v41, 0.0 }
 0x4ca   : > { %v1262_v44 = vsub.f32 %v770_v62, %v1254_v42  ;;  %v1263_v45 = vsub.f32 %v846_v63, %v1255_v43  ;;  %v1310_v37 = vsub.f32 0.0, %v1254_v42  ;;  %v1311_v33 = vsub.f32 0.0, %v1255_v43 }
 0x4cb   : > { %v3299_v46 = vpop.xlane.xlu0 %1239 }
 0x4cc   : > { %v1271_v47 = vmul.f32 1.442695, %v1262_v44  ;;  %v1273_v48 = vmul.f32 1.442695, %v1263_v45  ;;  %v1256_v49 = vmax.f32 %v3299_v46, 0.0 }
 0x4cd   : > { %v1319_v34 = vmul.f32 1.442695, %v1310_v37  ;;  %v1321_v44 = vmul.f32 1.442695, %v1311_v33 }
 0x4ce   : > { %2683 = vpow2.f32 %v1271_v47  ;;  %v1264_v50 = vsub.f32 %v922_v10, %v1256_v49 }
 0x4cf   : > { %v3304_v52 = vpop.xlane.xlu1 %1245  ;;  %v3306_v53 = vpop.xlane.xlu0 %1242  ;;  %2685 = vpow2.f32 %v1273_v48 }
 0x4d0   : > { %v1258_v54 = vmax.f32 %v3304_v52, 0.0  ;;  %v1257_v55 = vmax.f32 %v3306_v53, 0.0  ;;  %v1275_v56 = vmul.f32 1.442695, %v1264_v50 }
 0x4d2   : > { %v1266_v57 = vsub.f32 %v1074_v19, %v1258_v54  ;;  %v1265_v58 = vsub.f32 %v998_v14, %v1257_v55  ;;  %2687 = vpow2.f32 %v1275_v56  ;;  %v1314_v47 = vsub.f32 0.0, %v1258_v54 }
 0x4d3   : > { %v3314_v59 = vpop.xlane.xlu1 %1251  ;;  %v3316_v60 = vpop.xlane.xlu0 %1248  ;;  %v1313_v48 = vsub.f32 0.0, %v1257_v55 }
 0x4d4   : > { %v1279_v61 = vmul.f32 1.442695, %v1266_v57  ;;  %v1277_v62 = vmul.f32 1.442695, %v1265_v58  ;;  %v1260_v63 = vmax.f32 %v3314_v59, 0.0  ;;  %v1259_v2 = vmax.f32 %v3316_v60, 0.0 }
 0x4d5   : > { %v1327_v40 = vmul.f32 1.442695, %v1314_v47  ;;  %v1325_v42 = vmul.f32 1.442695, %v1313_v48 }
 0x4d6   : > { %2689 = vpow2.f32 %v1279_v61  ;;  %v1268_v3 = vsub.f32 %v1226_v27, %v1260_v63  ;;  %v1267_v4 = vsub.f32 %v1150_v23, %v1259_v2  ;;  %v1316_v41 = vsub.f32 0.0, %v1260_v63 }
 0x4d7   : > { %2691 = vpow2.f32 %v1277_v62  ;;  %v1882_v16 = vpop.permute.xlu1 %1881  ;;  %v1806_v17 = vpop.permute.xlu0 %1805  ;;  %v1315_v43 = vsub.f32 0.0, %v1259_v2 }
 0x4d8   : > { %v2684_v5 = vpop.eup %2683  ;;  %v1283_v6 = vmul.f32 1.442695, %v1268_v3  ;;  %v1281_v7 = vmul.f32 1.442695, %v1267_v4 }
 0x4d9   : > { %2519 = vmatmul.mubr.msk.f32.vlgmr.msra.gmra.mrb[10].mxu1 %vm622_vm2, %v2684_v5  ;;  %v2686_v8 = vpop.eup %2685  ;;  %v1288_v9 = vsel %vm622_vm2, %v2684_v5, 0.0  ;;  %v1329_v52 = vmul.f32 1.442695, %v1315_v43  ;;  %v1997_v5 = vld [vmem:[#allocation5] sm:$0xff] }
 0x4da   : > { %2527 = vmatpush3.msra.mxu1 %v1578_v39  ;;  %2528 = vmatprep.mubr.msk.f32.mxu1 %vm2897_vm1, %v2896_v30  ;;  %2693 = vpow2.f32 %v1283_v6  ;;  %v1291_v10 = vsel %vm622_vm2, %v2686_v8, 0.0  ;;  %v1312_v39 = vsub.f32 0.0, %v1256_v49  ;;  %v1331_v49 = vmul.f32 1.442695, %v1316_v41  ;;  %v1998_v6 = vld [vmem:[#allocation5 + $0x8] sm:$0xff] }
 0x4db   : > { %2524 = vmatmul.mubr.msk.f32.vlgmr.msra.gmra.mrb[10].mxu0 %vm622_vm2, %v2686_v8  ;;  %1289 = vadd.xlane.f32.xlu0 %v1288_v9  ;;  %2695 = vpow2.f32 %v1281_v7  ;;  %v2581_v9 = vpack.c.bf16 %v1998_v6, %v1997_v5 }
 0x4dc   : > { %2532 = vmatpush3.msra.mxu0 %v1654_v32  ;;  %1292 = vadd.xlane.f32.xlu1 %v1291_v10  ;;  %v2688_v11 = vpop.eup %2687  ;;  %2697 = vpow2.f32 %v1317_v26  ;;  %v1323_v45 = vmul.f32 1.442695, %v1312_v39 }
 0x4dd   : > { %2536 = vmatprep.subr.mxu1 %v2896_v30  ;;  %2533 = vmatprep.mubr.msk.f32.mxu0 %vm2897_vm1, %v2896_v30  ;;  %v1294_v12 = vsel %vm622_vm2, %v2688_v11, 0.0 }
 0x4de   : > { %2529 = vmatmul.mubr.msk.f32.vlgmr.msra.gmra.mrb[12].mxu1 %vm622_vm2, %v2688_v11  ;;  %2541 = vmatprep.subr.mxu0 %v2896_v30 }
 0x4df   : > { %2537 = vmatpush3.msra.mxu1 %v3244_v51  ;;  %1295 = vadd.xlane.f32.xlu0 %v1294_v12 }
 0x4e0   : > { %v2690_v13 = vpop.eup %2689  ;;  %2538 = vmatprep.mubr.msk.f32.mxu1 %vm2897_vm1, %v2896_v30  ;;  %2546 = vmatprep.subr.mxu1 %v2896_v30 }
 0x4e1   : > { %v1300_v14 = vsel %vm622_vm2, %v2690_v13, 0.0  ;;  %v2692_v15 = vpop.eup %2691 }
 0x4e2   : > { %2539 = vmatmul.mubr.msk.f32.vlgmr.msra.gmra.mrb[14].mxu1 %vm622_vm2, %v2690_v13  ;;  %2534 = vmatmul.mubr.msk.f32.vlgmr.msra.gmra.mrb[12].mxu0 %vm622_vm2, %v2692_v15  ;;  %v1297_v21 = vsel %vm622_vm2, %v2692_v15, 0.0 }
 0x4e3   : > { %2547 = vmatpush3.msra.mxu1 %v1882_v16  ;;  %2542 = vmatpush3.msra.mxu0 %v1806_v17  ;;  %v1999_v17 = vld [vmem:[#allocation5 + $0x10] sm:$0xff] }
 0x4e4   : > { %1301 = vadd.xlane.f32.xlu0 %v1300_v14  ;;  %v2694_v51 = vpop.eup %2693  ;;  %2543 = vmatprep.mubr.msk.f32.mxu0 %vm2897_vm1, %v2896_v30 }
 0x4e5   : > { %2548 = vmatprep.mubr.msk.f32.mxu1 %vm2897_vm1, %v2896_v30  ;;  %v1306_v18 = vsel %vm622_vm2, %v2694_v51, 0.0  ;;  %v2696_v19 = vpop.eup %2695  ;;  %2582 = vmatprep.subr.bf16.mxu0 %v2581_v9 }
 0x4e6   : > { %2549 = vmatmul.mubr.msk.f32.vlgmr.msra.gmra.mrb[16].mxu1 %vm622_vm2, %v2694_v51  ;;  %1307 = vadd.xlane.f32.xlu1 %v1306_v18  ;;  %v1303_v20 = vsel %vm622_vm2, %v2696_v19, 0.0  ;;  %v2698_v31 = vpop.eup %2697  ;;  %v2000_v51 = vld [vmem:[#allocation5 + $0x18] sm:$0xff] }
 0x4e7   : > { %2544 = vmatmul.mubr.msk.f32.vlgmr.msra.gmra.mrb[14].mxu0 %vm622_vm2, %v2696_v19 }
 0x4e8   : > { %1304 = vadd.xlane.f32.xlu0 %v1303_v20  ;;  %2584 = vmatpush3.bf16.msra.mxu0 %v2581_v9  ;;  %v2585_v20 = vpack.c.bf16 %v2000_v51, %v1999_v17 }
 0x4ea   : > { %1298 = vadd.xlane.f32.xlu1 %v1297_v21  ;;  %2586 = vmatprep.subr.bf16.mxu0 %v2585_v20 }
 0x4ec   : > { %1286 = vadd.xlane.f32.xlu0 %v1285_v22  ;;  %2588 = vmatpush3.bf16.msra.mxu0 %v2585_v20 }
 0x542   : > { %v1421_v23 = vpop.f32.mrb[8].mxu0 }
 0x543   : > { %v2515_v30 = vpop.f32.mrb[9].mxu0 }
 0x568   : > { %v1290_v25 = vpop.xlane.xlu0 %1289 }
 0x569   : > { %v1293_v46 = vpop.xlane.xlu1 %1292 }
 0x56c   : > { %v1296_v27 = vpop.xlane.xlu0 %1295 }
 0x571   : > { %v1302_v28 = vpop.xlane.xlu0 %1301 }
 0x573   : > { %v1308_v57 = vpop.xlane.xlu1 %1307 }
 0x575   : > { %v1305_v29 = vpop.xlane.xlu0 %1304 }
 0x577   : > { %v1299_v59 = vpop.xlane.xlu1 %1298 }
 0x579   : > { %v1287_v32 = vpop.xlane.xlu0 %1286 }
 0x57a   : > { %v1333_v35 = vadd.f32 %v2698_v31, %v1287_v32 }
 0x57c   : > { %2699 = vrcp.f32 %v1333_v35 }
 0x57d   : > { %2701 = vpow2.f32 %v1319_v34 }
 0x57e   : > { %2703 = vpow2.f32 %v1321_v44 }
 0x57f   : > { %2705 = vpow2.f32 %v1323_v45 }
 0x580   : > { %2707 = vpow2.f32 %v1327_v40 }
 0x581   : > { %2709 = vpow2.f32 %v1325_v42 }
 0x582   : > { %2711 = vpow2.f32 %v1331_v49 }
 0x583   : > { %2713 = vpow2.f32 %v1329_v52 }
 0x586   : > { %v2700_v36 = vpop.eup %2699 }
 0x587   : > { %v3356_v38 = vmul.f32 %v2700_v36, %v1421_v23  ;;  %v2702_v50 = vpop.eup %2701 }
 0x588   : > { %v1334_v54 = vadd.f32 %v2702_v50, %v1290_v25  ;;  %v2704_v56 = vpop.eup %2703 }
 0x589   : > { %v1335_v53 = vadd.f32 %v2704_v56, %v1293_v46  ;;  %v2706_v55 = vpop.eup %2705 }
 0x58a   : > { %2715 = vrcp.f32 %v1334_v54  ;;  %v1336_v58 = vadd.f32 %v2706_v55, %v1296_v27  ;;  %v2708_v61 = vpop.eup %2707  ;;  %v2094_v55 = vld [vmem:[#allocation7 + $0x18] sm:$0xff] }
 0x58b   : > { %2717 = vrcp.f32 %v1335_v53  ;;  %v2710_v60 = vpop.eup %2709  ;;  %v1338_v62 = vadd.f32 %v2708_v61, %v1302_v28  ;;  %v2091_v28 = vld [vmem:[#allocation7] sm:$0xff]  ;;  %v2093_v53 = vld [vmem:[#allocation7 + $0x10] sm:$0xff] }
 0x58c   : > { %2719 = vrcp.f32 %v1336_v58  ;;  %v1337_v63 = vadd.f32 %v2710_v60, %v1299_v59  ;;  %v2712_v2 = vpop.eup %2711  ;;  %v2593_v58 = vpack.c.bf16 %v2094_v55, %v2093_v53 }
 0x58d   : > { %v2714_v3 = vpop.eup %2713  ;;  %2721 = vrcp.f32 %v1338_v62  ;;  %v1340_v4 = vadd.f32 %v2712_v2, %v1308_v57 }
 0x58e   : > { %2723 = vrcp.f32 %v1337_v63  ;;  %v1339_v10 = vadd.f32 %v2714_v3, %v1305_v29  ;;  %v2092_v29 = vld [vmem:[#allocation7 + $0x8] sm:$0xff]  ;;  %v2398_v3 = vld [vmem:[%s3463_s7] ss:$0 sm:$0xff] }
 0x58f   : > { %2725 = vrcp.f32 %v1340_v4  ;;  %v2589_v35 = vpack.c.bf16 %v2092_v29, %v2091_v28 }
 0x590   : > { %2727 = vrcp.f32 %v1339_v10 }
 0x591   : > { %2590 = vmatprep.subr.bf16.mxu1 %v2589_v35 }
 0x592   : > { %2592 = vmatpush3.bf16.msra.mxu1 %v2589_v35 }
 0x593   : > { %2594 = vmatprep.subr.bf16.mxu1 %v2593_v58 }
 0x594   : > { %v2716_v7 = vpop.eup %2715 }
 0x595   : > { %v2718_v13 = vpop.eup %2717 }
 0x596   : > { %v2720_v18 = vpop.eup %2719  ;;  %2596 = vmatpush3.bf16.msra.mxu1 %v2593_v58 }
 0x597   : > { %v2722_v23 = vpop.eup %2721 }
 0x598   : > { %v2724_v24 = vpop.eup %2723 }
 0x599   : > { %v2726_v36 = vpop.eup %2725 }
 0x59a   : > { %v2728_v39 = vpop.eup %2727 }
 0x5ac   : > { %v1497_v8 = vpop.f32.mrb[10].mxu1 }
 0x5ad   : > { %v1958_v11 = vmul.f32 %v2716_v7, %v1497_v8  ;;  %v2520_v12 = vpop.f32.mrb[11].mxu1 }
 0x5ae   : > { %v1573_v14 = vpop.f32.mrb[10].mxu0 }
 0x5af   : > { %v1959_v15 = vmul.f32 %v2718_v13, %v1573_v14  ;;  %v2525_v16 = vpop.f32.mrb[11].mxu0  ;;  %1967 = vrot.lane.b32.xlu0 %v1958_v11, %s2903_s22 }
 0x5b1   : > { %1975 = vrot.lane.b32.xlu1 %v1959_v15, %s2904_s18  ;;  %v1649_v19 = vpop.f32.mrb[12].mxu1 }
 0x5b2   : > { %v1960_v21 = vmul.f32 %v2720_v18, %v1649_v19  ;;  %v2530_v22 = vpop.f32.mrb[13].mxu1 }
 0x5b4   : > { %1983 = vrot.lane.b32.xlu0 %v1960_v21, %s2905_s28 }
 0x5b5   : > { %v1801_v30 = vpop.f32.mrb[14].mxu1  ;;  %v1725_v25 = vpop.f32.mrb[12].mxu0 }
 0x5b6   : > { %v1962_v26 = vmul.f32 %v2722_v23, %v1801_v30  ;;  %v2540_v27 = vpop.f32.mrb[15].mxu1  ;;  %v1961_v31 = vmul.f32 %v2724_v24, %v1725_v25  ;;  %v2535_v32 = vpop.f32.mrb[13].mxu0  ;;  %v2401_v25 = vld [vmem:[%s3464_s8] ss:$0 sm:$0xff] }
 0x5b7   : > { %v2402_v27 = vld [vmem:[%s3465_s9] ss:$0 sm:$0xff] }
 0x5b8   : > { %1969 = vrot.lane.b32.xlu1 %v1962_v26, %s2903_s22 }
 0x5b9   : > { %v1953_v37 = vpop.f32.mrb[16].mxu1 }
 0x5ba   : > { %v1964_v33 = vmul.f32 %v2726_v36, %v1953_v37  ;;  %v2550_v34 = vpop.f32.mrb[17].mxu1  ;;  %v1877_v44 = vpop.f32.mrb[14].mxu0 }
 0x5bb   : > { %v1963_v45 = vmul.f32 %v2728_v39, %v1877_v44  ;;  %v2545_v47 = vpop.f32.mrb[15].mxu0 }
 0x5bd   : > { %1977 = vrot.lane.b32.xlu1 %v1963_v45, %s2904_s18  ;;  %s2409_s18 = sshll.u32 %s2984_s17, 8  ;;  %s2232_s17 = scalar_lea.sflag [#allocation4], %s3144_s20 }
 0x5be   : > { %s3408_s13 = scalar_lea.hbm %s3466_s10, %s2409_s18 }
 0x5c1   : > { %1985 = vrot.lane.b32.xlu1 %v1964_v33, %s2905_s28  ;;  %s420_s28 = scalar_lea.vmem [#allocation8], %s2355_s12  ;;  %s2906_s12 = smov [#allocation8]  }
 0x5c2   : > { %s2245_s19 = sshll.u32 %s420_s28, 4  ;;  %s2823_s26 = sshll.u32 %s2906_s12, 4  ;;  %s3410_s19 = int_to_ptr.vmem [resolvable:$true] %s2245_s19  ;;  %s2824_s26 = int_to_ptr.vmem [resolvable:$false] %s2823_s26 }
 0x5c3   : > { %s2819_s29 = scalar_lea.vmem %s3410_s19, 256  ;;  %s2825_s23 = scalar_lea.vmem %s2824_s26, 512 }
 0x5c4   : > { %p2820_p0 = scmp.ne.s32.totalorder %s3410_s19, %s2819_s29  ;;  %p2826_p9 = scmp.lt.s32.totalorder %s3410_s19, %s2824_s26 }
 0x5c5   : > { %p2827_p12 = scmp.lt.s32.totalorder %s2825_s23, %s2819_s29 }
 0x5c6   : > { %p2821_p3 = pnand %p2820_p0, %p3488_p2 }
 0x5c7   : > { %p2828_p1 = por %p2827_p12, %p2826_p9 }
 0x5c8   : > { %p2822_p7 = pneg %p2821_p3 }
 0x5ca   : > { %p2829_p13 = pnand %p2828_p1, %p2822_p7 }
 0x621   : > { %v1968_v48 = vpop.permute.xlu0 %1967 }
 0x622   : > { %v1989_v41 = vsel %vm622_vm2, %v3356_v38, %v1968_v48  ;;  %v2395_v38 = vld [vmem:[%s3461_s5] ss:$0 sm:$0xff] }
 0x623   : > { %v1976_v40 = vpop.permute.xlu1 %1975 }
 0x624   : > { %v1992_v42 = vsel %vm1991_vm3, %v1989_v41, %v1976_v40 }
 0x626   : > { %v1984_v43 = vpop.permute.xlu0 %1983 }
 0x627   : > { %v1995_v46 = vsel %vm1994_vm4, %v1992_v42, %v1984_v43 }
 0x628   : > { %2559 = vmatprep.mubr.msk.f32.mxu0 %vm430_vm0, %v1995_v46 }
 0x62a   : > { %v1970_v49 = vpop.permute.xlu1 %1969 }
 0x62b   : > { %v1990_v52 = vsel %vm622_vm2, %v1961_v31, %v1970_v49 }
 0x62f   : > { %v1978_v50 = vpop.permute.xlu1 %1977 }
 0x630   : > { %v1993_v54 = vsel %vm1991_vm3, %v1990_v52, %v1978_v50 }
 0x633   : > { %v1986_v56 = vpop.permute.xlu1 %1985 }
 0x634   : > { %v1996_v57 = vsel %vm1994_vm4, %v1993_v54, %v1986_v56 }
 0x635   : > { %2560 = vmatmul.mubr.msk.f32.vlgmr.msra.gmra.mrb[16].mxu0 %vm430_vm0, %v1996_v57 }
 0x708   : > { %v2561_v59 = vpop.f32.mrb[16].mxu0 }
 0x709   : > { %v2086_v61 = vadd.f32 %v2561_v59, %v2395_v38  ;;  %v2080_v60 = vpop.f32.mrb[17].mxu0 }
 0x70a   : > { %v2081_v62 = vadd.f32 %v2395_v38, %v2080_v60 }
 0x70b   : > { %v2090_v2 = vadd.f32 %v2086_v61, %v3160_v1 }
 0x70c   : > { %v2089_v63 = vadd.f32 %v2081_v62, %v3158_v0 }
 0x70e   : > { %2570 = vmatprep.mubr.msk.f32.mxu1 %vm430_vm0, %v2089_v63 }
 0x70f   : > { %2571 = vmatmul.mubr.msk.f32.vlgmr.msra.gmra.mrb[18].mxu1 %vm430_vm0, %v2090_v2 }
 0x7e2   : > { %v2572_v4 = vpop.f32.mrb[18].mxu1 }
 0x7e3   : > { %v2180_v5 = vadd.f32 %v2572_v4, %v2398_v3  ;;  %v2174_v6 = vpop.f32.mrb[19].mxu1 }
 0x7e4   : > { %v2175_v7 = vadd.f32 %v2398_v3, %v2174_v6 }
 0x7e5   : > { %v2184_v8 = vmax.f32 %v2180_v5, 0.0 }
 0x7e6   : > { %v2183_v9 = vmax.f32 %v2175_v7, 0.0 }
 0x7e7   : > { %v2188_v10 = vsel %vm430_vm0, %v2184_v8, 0.0 }
 0x7e8   : > { %2189 = vadd.xlane.f32.xlu1 %v2188_v10  ;;  %v2185_v0 = vsel %vm430_vm0, %v2183_v9, 0.0 }
 0x7e9   : > { %2186 = vadd.xlane.f32.xlu0 %v2185_v0 }
 0x875   : > { %v2190_v1 = vpop.xlane.xlu1 %2189 }
 0x876   : > { %v2192_v11 = vmul.f32 0.03125, %v2190_v1  ;;  %v2187_v12 = vpop.xlane.xlu0 %2186 }
 0x877   : > { %v2191_v13 = vmul.f32 0.03125, %v2187_v12 }
 0x878   : > { %v2194_v14 = vsub.f32 %v2184_v8, %v2192_v11 }
 0x879   : > { %v2193_v15 = vsub.f32 %v2183_v9, %v2191_v13 }
 0x87a   : > { %v2196_v51 = vmul.f32 %v2194_v14, %v2194_v14 }
 0x87b   : > { %v2195_v16 = vmul.f32 %v2193_v15, %v2193_v15 }
 0x87c   : > { %v2200_v18 = vsel %vm430_vm0, %v2196_v51, 0.0 }
 0x87d   : > { %v2197_v17 = vsel %vm430_vm0, %v2195_v16, 0.0 }
 0x87e   : > { %2198 = vadd.xlane.f32.xlu0 %v2197_v17 }
 0x882   : > { %2201 = vadd.xlane.f32.xlu0 %v2200_v18 }
 0x90b   : > { %v2199_v19 = vpop.xlane.xlu0 %2198 }
 0x90c   : > { %v2203_v20 = vmul.f32 0.03125, %v2199_v19 }
 0x90e   : > { %v2205_v21 = vadd.f32 1e-05, %v2203_v20 }
 0x90f   : > { %v2202_v22 = vpop.xlane.xlu0 %2201 }
 0x910   : > { %2729 = vrsqrt.f32 %v2205_v21  ;;  %v2204_v23 = vmul.f32 0.03125, %v2202_v22 }
 0x912   : > { %v2206_v30 = vadd.f32 1e-05, %v2204_v23 }
 0x914   : > { %2731 = vrsqrt.f32 %v2206_v30 }
 0x91a   : > { %v2730_v24 = vpop.eup %2729 }
 0x91b   : > { %v2209_v26 = vmul.f32 %v2730_v24, %v2193_v15 }
 0x91d   : > { %v2218_v28 = vmul.f32 %v2401_v25, %v2209_v26 }
 0x91e   : > { %v2732_v29 = vpop.eup %2731 }
 0x91f   : > { %v2227_v31 = vadd.f32 %v2402_v27, %v2218_v28  ;;  %v2210_v32 = vmul.f32 %v2732_v29, %v2194_v14 }
 0x921   : > { %v2219_v35 = vmul.f32 %v2401_v25, %v2210_v32  ;;  %2229 = vst.msk [vmem:[%s420_s28] sm:$0xff] %vm430_vm0, %v2227_v31 }
 0x923   : > { %v2228_v36 = vadd.f32 %v2402_v27, %v2219_v35 }
 0x925   : > { %2230 = vst.msk [vmem:[%s420_s28 + $0x8] sm:$0xff] %vm430_vm0, %v2228_v36 }
 0x926   : > { %2832 = shalt.err (!%p2829_p13)
}
 0x927   : > { %s2833_s27 = scalar_lea.hbm %s3408_s13, 256  ;;  %s2837_s21 = scalar_lea.hbm %s3466_s10, 512 }
 0x928   : > { %p2834_p6 = scmp.ne.s32.totalorder %s3408_s13, %s2833_s27  ;;  %p2838_p5 = scmp.lt.u32.totalorder %s3408_s13, %s3466_s10 }
 0x929   : > { %p2839_p8 = scmp.lt.u32.totalorder %s2837_s21, %s2833_s27  ;;  %p2841_p0 = scmp.lt.u32.totalorder %s2833_s27, %s3408_s13 }
 0x92a   : > { %p2835_p10 = pnand %p2834_p6, %p3488_p2 }
 0x92b   : > { %p2840_p11 = por %p2839_p8, %p2838_p5 }
 0x92c   : > { %p2836_p4 = pneg %p2835_p10 }
 0x92d   : > { %p2842_p3 = por %p2841_p0, %p2840_p11 }
 0x92f   : > { %p2843_p7 = pnand %p2842_p3, %p2836_p4 }
 0x931   : > { %2846 = shalt.err (!%p2843_p7)
}
 0x932   : > { %s2907_s29 = smov 128  }
 0x933   : > { %2607 = dma.vmem_to_hbm [thread:$0]  (%p3488_p2), %s3410_s19, 256, %s3408_s13, %s2232_s17, %s2907_s29, %s2907_s29, %s2903_s22  }
 0x934 PF: > { %s3489_s26 = sld [smem:[#allocation12_spill]]  ;;  %s3490_s23 = sld [smem:[#allocation13_spill]] }
 0x935   : > { %p3492_p12 = scmp.ge.s32.totalorder %s2889_s16, 2 }
 0x93a   : > { %s2260_s18 = sand.u32 1, %s3489_s26   ;;  %p3491_p9 = scmp.ne.s32.totalorder %s3490_s23, 0 }
 0x93b   : > { %s2261_s27 = scalar_lea.sflag [#allocation4], %s2260_s18 }
 0x93c   : > { %p2621_p1 = pnand %p3492_p12, %p3491_p9 }
 0x93e   : > { %2872 = dma.done.wait (!%p2621_p1), %s2261_s27, 256  }
 0x93f   : > { %2874 = vsyncadd (!%p2621_p1), %s2261_s27, 4294967040  ;;  %p24_p13 = scmp.ge.s32.totalorder %s3079_s24, 4   ;;  %s3493_s13 = smov %s2881_s14 }
 0x940   : > { %s3494_s14 = smov %s2885_s15  ;;  %s3495_s15 = smov %s3095_s11 }
 0x941   : > { %s3496_s16 = smov %s3079_s24  ;;  %26 = sbr.rel (!%p24_p13) target bundleno = 6 (0x6), region = 116 }
 0x948   :  { %2266 = vsyncpa [#allocation3], 1 }
 0x949   :  { %2268 = vsyncpa [#allocation3 + $0x1], 1 }
 0x94a   :  { %2269 = vsyncpa [#allocation6], 1 }
 0x94b   :  { %2270 = vsyncpa [#allocation4], 1 }
 0x94c   :  { %2272 = vsyncpa [#allocation4 + $0x1], 1 }

</bundles_post_ra>
